<compile_context>
chip_gen: v7x
topology: tpu7x:2x2x1
jax: 0.10.0
libtpu: 0.0.40
codegen_flags: <defaults>
</compile_context>

<pallas_src>
import functools
import numpy as np

import jax
import jax.numpy as jnp
from jax.experimental import pallas as pl
from jax.experimental.pallas import tpu as pltpu

_LN_EPS = 1e-5
_REVIN_EPS = 1e-5
_DENORM_EPS = _REVIN_EPS * _REVIN_EPS


def _apply_act(y, act):
    if act == "relu":
        return jnp.maximum(y, 0.0)
    if act == "gelu":
        return jax.nn.gelu(y, approximate=True)
    return y


# ----------------------------------------------------------------------------
# The single fused forward kernel
# ----------------------------------------------------------------------------
def _fused_forward_kernel(
        # inputs
        x_ref,                       # (1, N, T)  f32   per-batch block
        rw_ref, rb_ref,              # (N, 1)     f32   RevIN affine (constant)
        a_in_ref, b_in_ref,          # (T, dm) bf16, (1, dm) f32   folded input linear
        A_ref,                       # (1, N, N)  bf16  softmax(token mix)  [layer]
        w1_ref, b1_ref,              # (1, dm, dff) bf16, (1, 1, dff) f32   [layer]
        w2_ref, b2_ref,              # (1, dff, dm) bf16, (1, 1, dm) f32    [layer]
        g1_ref, be1_ref,             # (1, 1, dm) f32  LN1                  [layer]
        g2_ref, be2_ref,             # (1, 1, dm) f32  LN2                  [layer]
        encg_ref, encb_ref,          # (1, dm)    f32  final encoder LN
        wc_ref, we_ref, bfc1_ref,    # (dm, dff) bf16, (T, dff) bf16, (1, dff) f32
        wfc2_ref, bfc2_ref,          # (dff, P) bf16, (1, P) f32
        # output
        out_ref,                     # (1, N, P)  f32
        # VMEM scratch (persist across the layer axis)
        h_scr,                       # (N, dm)  f32   residual stream
        xn_scr,                      # (N, T)   bf16  RevIN'd input
        mean_scr, std_scr,           # (N, 1)   f32   RevIN stats
        *, act):
    layer = pl.program_id(1)
    last = pl.num_programs(1) - 1

    # ---- once per batch block: RevIN norm + folded (wavelet+emb+ot_in) linear
    @pl.when(layer == 0)
    def _():
        x = x_ref[0]                                          # (N, T) f32
        mu = jnp.mean(x, axis=-1, keepdims=True)
        var = jnp.mean((x - mu) ** 2, axis=-1, keepdims=True)
        std = jnp.sqrt(var + _REVIN_EPS)
        xn = (x - mu) / std * rw_ref[...] + rb_ref[...]
        mean_scr[...] = mu
        std_scr[...] = std
        xnb = xn.astype(jnp.bfloat16)
        xn_scr[...] = xnb
        h_scr[...] = (jnp.dot(xnb, a_in_ref[...],
                              preferred_element_type=jnp.float32)
                      + b_in_ref[...])

    # ---- encoder layer `layer`: token mix + res + LN1 ; FFN + res + LN2 ----
    h = h_scr[...]                                            # (N, dm) f32
    mixed = jnp.dot(A_ref[0], h.astype(jnp.bfloat16),
                    preferred_element_type=jnp.float32)       # mix over variates
    y = h + mixed
    mu = jnp.mean(y, axis=-1, keepdims=True)
    var = jnp.mean((y - mu) ** 2, axis=-1, keepdims=True)
    y = (y - mu) * jax.lax.rsqrt(var + _LN_EPS) * g1_ref[0] + be1_ref[0]

    ff = jnp.dot(y.astype(jnp.bfloat16), w1_ref[0],
                 preferred_element_type=jnp.float32) + b1_ref[0]
    ff = _apply_act(ff, act)
    ff = jnp.dot(ff.astype(jnp.bfloat16), w2_ref[0],
                 preferred_element_type=jnp.float32) + b2_ref[0]
    z = y + ff
    mu = jnp.mean(z, axis=-1, keepdims=True)
    var = jnp.mean((z - mu) ** 2, axis=-1, keepdims=True)
    z = (z - mu) * jax.lax.rsqrt(var + _LN_EPS) * g2_ref[0] + be2_ref[0]
    h_scr[...] = z

    # ---- last layer: final LN + fc1(gelu) + fc2 + RevIN denorm -------------
    @pl.when(layer == last)
    def _():
        mu = jnp.mean(z, axis=-1, keepdims=True)
        var = jnp.mean((z - mu) ** 2, axis=-1, keepdims=True)
        e = (z - mu) * jax.lax.rsqrt(var + _LN_EPS) * encg_ref[...] + encb_ref[...]
        # fc1 = gelu(enc_out @ Wc + xn @ We + b_fc1)   (concat replaced by 2 dots)
        hfc = (jnp.dot(e.astype(jnp.bfloat16), wc_ref[...],
                       preferred_element_type=jnp.float32)
               + jnp.dot(xn_scr[...], we_ref[...],
                         preferred_element_type=jnp.float32)
               + bfc1_ref[...])
        hfc = jax.nn.gelu(hfc, approximate=True)
        o = jnp.dot(hfc.astype(jnp.bfloat16), wfc2_ref[...],
                    preferred_element_type=jnp.float32) + bfc2_ref[...]
        # RevIN denorm (dropout is identity in eval)
        o = (o - rb_ref[...]) / (rw_ref[...] + _DENORM_EPS)
        o = o * std_scr[...] + mean_scr[...]
        out_ref[0] = o.astype(out_ref.dtype)


# ----------------------------------------------------------------------------
# Wavelet analysis / synthesis matrices (exact matmul form of the convs)
# ----------------------------------------------------------------------------
_DEC_LO = [-0.12940952255126037, 0.22414386804201339, 0.8365163037378079, 0.48296291314453416]
_DEC_HI = [-0.48296291314453416, 0.8365163037378079, -0.22414386804201339, -0.12940952255126037]
_REC_LO = [0.48296291314453416, 0.8365163037378079, 0.22414386804201339, -0.12940952255126037]
_REC_HI = [-0.12940952255126037, -0.22414386804201339, 0.8365163037378079, -0.48296291314453416]


def _conv_matrix(filt, T, stride, pad, out_keep):
    """Matrix M (T, out_keep) s.t. F.conv1d(x, filt, stride, pad) == x @ M."""
    K = len(filt)
    L_out = (T + 2 * pad - K) // stride + 1
    M = np.zeros((T, L_out), dtype=np.float32)
    for o in range(L_out):
        for k in range(K):
            t = o * stride + k - pad
            if 0 <= t < T:
                M[t, o] = filt[k]
    return M[:, :out_keep]


def _conv_transpose_matrix(filt, L_in, stride, pad, T_out):
    """Matrix M (L_in, T_out) s.t. F.conv_transpose1d(y, filt, stride, pad) == y @ M."""
    K = len(filt)
    L_full = (L_in - 1) * stride - 2 * pad + K
    M = np.zeros((L_in, L_full), dtype=np.float32)
    for o in range(L_in):
        for k in range(K):
            t = o * stride + k - pad
            if 0 <= t < L_full:
                M[o, t] = filt[k]
    return M[:, :T_out]


def make_wavelet_matrices(T):
    K = len(_DEC_LO)
    Th = T // 2
    pad_dec = K // 2
    pad_rec = K // 2 - 1
    m_lo = _conv_matrix(_DEC_LO, T, 2, pad_dec, Th)
    m_hi = _conv_matrix(_DEC_HI, T, 2, pad_dec, Th)
    M_dec = np.concatenate([m_lo, m_hi], axis=1)            # (T, 2*Th)
    r_lo = _conv_transpose_matrix(_REC_LO, Th, 2, pad_rec, T)
    r_hi = _conv_transpose_matrix(_REC_HI, Th, 2, pad_rec, T)
    M_rec = np.concatenate([r_lo, r_hi], axis=0)             # (2*Th, T)
    return jnp.asarray(M_dec), jnp.asarray(M_rec)


# ----------------------------------------------------------------------------
# Parameter init (raw, PyTorch-shaped) + one-time folding / stacking / casting
# ----------------------------------------------------------------------------
def _dense(key, fan_in, fan_out):
    kw, kb = jax.random.split(key)
    lim = 1.0 / np.sqrt(fan_in)
    w = jax.random.uniform(kw, (fan_in, fan_out), jnp.float32, -lim, lim)
    b = jax.random.uniform(kb, (fan_out,), jnp.float32, -lim, lim)
    return w, b


def init_params(key, cfg):
    T, N, D = cfg["seq_len"], cfg["enc_in"], cfg["embed_size"]
    dm, dff, pl_ = cfg["d_model"], cfg["d_ff"], cfg["pred_len"]
    Th = T // 2
    in_dim = Th * D * 2

    keys = jax.random.split(key, 16)
    params = {}
    params["embeddings"] = jax.random.normal(keys[0], (1, D), jnp.float32)
    params["revin_w"] = jnp.ones((N,), jnp.float32)
    params["revin_b"] = jnp.zeros((N,), jnp.float32)

    M_dec, M_rec = make_wavelet_matrices(T)
    params["M_dec"], params["M_rec"] = M_dec, M_rec

    params["ot_w_in"], params["ot_b_in"] = _dense(keys[1], in_dim, dm)
    params["ot_w_out"], params["ot_b_out"] = _dense(keys[2], dm, in_dim)

    layers = []
    lkeys = jax.random.split(keys[3], cfg["e_layers"] * 3)
    for li in range(cfg["e_layers"]):
        w_tok = 0.02 * jax.random.normal(lkeys[3 * li], (N, N), jnp.float32)
        w1, b1 = _dense(lkeys[3 * li + 1], dm, dff)
        w2, b2 = _dense(lkeys[3 * li + 2], dff, dm)
        layers.append(dict(
            w_tok=w_tok, w1=w1, b1=b1, w2=w2, b2=b2,
            ln1_g=jnp.ones((dm,), jnp.float32), ln1_b=jnp.zeros((dm,), jnp.float32),
            ln2_g=jnp.ones((dm,), jnp.float32), ln2_b=jnp.zeros((dm,), jnp.float32),
        ))
    params["enc_layers"] = layers
    params["enc_norm_g"] = jnp.ones((dm,), jnp.float32)
    params["enc_norm_b"] = jnp.zeros((dm,), jnp.float32)

    params["fc_w1"], params["fc_b1"] = _dense(keys[4], T * D, dff)
    params["fc_w2"], params["fc_b2"] = _dense(keys[5], dff, pl_)
    return params


def prepare_params(params, cfg):
    """One-time algebraic fold of the purely-linear sub-chains, layer stacking
    and bf16 casting.  (Same linear algebra as the unfused model.)"""
    T, D = cfg["seq_len"], cfg["embed_size"]
    dm, dff = cfg["d_model"], cfg["d_ff"]
    Th = T // 2
    M_dec, M_rec = params["M_dec"], params["M_rec"]
    emb = params["embeddings"].reshape(D)

    # folded input linear: h = xn_t @ A_in + b_in
    w_in_3d = params["ot_w_in"].reshape(D, 2 * Th, dm)
    A_in = jnp.einsum("tj,djm,d->tm", M_dec, w_in_3d, emb)                # (T, dm)

    # folded fc1 inputs: gelu(enc_out @ Wc + xn_t @ We + bc)
    fc_w1_3d = params["fc_w1"].reshape(T, D, dff)
    w_out_3d = params["ot_w_out"].reshape(dm, D, 2 * Th)
    Wc = jnp.einsum("mdj,jt,tdf->mf", w_out_3d, M_rec, fc_w1_3d)          # (dm, dff)
    We = jnp.einsum("d,tdf->tf", emb, fc_w1_3d)                           # (T, dff)
    b_out_3d = params["ot_b_out"].reshape(D, 2 * Th)
    bc = params["fc_b1"] + jnp.einsum("dj,jt,tdf->f", b_out_3d, M_rec, fc_w1_3d)

    layers = params["enc_layers"]
    L = len(layers)
    stack = lambda k: jnp.stack([lyr[k] for lyr in layers], axis=0)

    rp = dict(
        A_in=A_in.astype(jnp.bfloat16),
        b_in=params["ot_b_in"].reshape(1, dm).astype(jnp.float32),
        A_soft=jnp.stack([jax.nn.softmax(lyr["w_tok"], axis=-1)
                          for lyr in layers], axis=0).astype(jnp.bfloat16),
        w1=stack("w1").astype(jnp.bfloat16),
        b1=stack("b1").reshape(L, 1, dff).astype(jnp.float32),
        w2=stack("w2").astype(jnp.bfloat16),
        b2=stack("b2").reshape(L, 1, dm).astype(jnp.float32),
        ln1_g=stack("ln1_g").reshape(L, 1, dm).astype(jnp.float32),
        ln1_b=stack("ln1_b").reshape(L, 1, dm).astype(jnp.float32),
        ln2_g=stack("ln2_g").reshape(L, 1, dm).astype(jnp.float32),
        ln2_b=stack("ln2_b").reshape(L, 1, dm).astype(jnp.float32),
        enc_norm_g=params["enc_norm_g"].reshape(1, dm).astype(jnp.float32),
        enc_norm_b=params["enc_norm_b"].reshape(1, dm).astype(jnp.float32),
        Wc=Wc.astype(jnp.bfloat16),
        We=We.astype(jnp.bfloat16),
        b_fc1=bc.reshape(1, dff).astype(jnp.float32),
        fc_w2=params["fc_w2"].astype(jnp.bfloat16),
        fc_b2=params["fc_b2"].reshape(1, -1).astype(jnp.float32),
        revin_w=params["revin_w"].reshape(-1, 1).astype(jnp.float32),
        revin_b=params["revin_b"].reshape(-1, 1).astype(jnp.float32),
    )
    return rp


# ----------------------------------------------------------------------------
# Model forward: one fused pallas_call
# ----------------------------------------------------------------------------
def model_forward(rp, x, cfg):
    """x: (B, T, N) -> (B, pred_len, N)."""
    B, T, N = x.shape
    dm, dff, P = cfg["d_model"], cfg["d_ff"], cfg["pred_len"]
    L = cfg["e_layers"]
    act = cfg["activation"]

    # layout plumbing only: (B, T, N) -> (B, N, T) so each grid block is a
    # full set of variates for one batch element.
    x_bnt = jnp.transpose(x, (0, 2, 1))

    batch3 = lambda i, l: (i, 0, 0)     # per-batch blocks (input / output)
    layer3 = lambda i, l: (l, 0, 0)     # per-layer stacked weights
    const2 = lambda i, l: (0, 0)        # constant (whole-array) blocks

    in_specs = [
        pl.BlockSpec((1, N, T), batch3),            # x
        pl.BlockSpec((N, 1), const2),               # revin_w
        pl.BlockSpec((N, 1), const2),               # revin_b
        pl.BlockSpec((T, dm), const2),              # A_in (folded)
        pl.BlockSpec((1, dm), const2),              # b_in
        pl.BlockSpec((1, N, N), layer3),            # A_soft
        pl.BlockSpec((1, dm, dff), layer3),         # w1
        pl.BlockSpec((1, 1, dff), layer3),          # b1
        pl.BlockSpec((1, dff, dm), layer3),         # w2
        pl.BlockSpec((1, 1, dm), layer3),           # b2
        pl.BlockSpec((1, 1, dm), layer3),           # ln1_g
        pl.BlockSpec((1, 1, dm), layer3),           # ln1_b
        pl.BlockSpec((1, 1, dm), layer3),           # ln2_g
        pl.BlockSpec((1, 1, dm), layer3),           # ln2_b
        pl.BlockSpec((1, dm), const2),              # enc_norm_g
        pl.BlockSpec((1, dm), const2),              # enc_norm_b
        pl.BlockSpec((dm, dff), const2),            # Wc (folded)
        pl.BlockSpec((T, dff), const2),             # We (folded)
        pl.BlockSpec((1, dff), const2),             # b_fc1
        pl.BlockSpec((dff, P), const2),             # fc_w2
        pl.BlockSpec((1, P), const2),               # fc_b2
    ]

    out = pl.pallas_call(
        functools.partial(_fused_forward_kernel, act=act),
        grid=(B, L),
        in_specs=in_specs,
        out_specs=pl.BlockSpec((1, N, P), batch3),
        out_shape=jax.ShapeDtypeStruct((B, N, P), jnp.float32),
        scratch_shapes=[
            pltpu.VMEM((N, dm), jnp.float32),   # residual stream
            pltpu.VMEM((N, T), jnp.bfloat16),   # RevIN'd input (bf16 MXU feed)
            pltpu.VMEM((N, 1), jnp.float32),    # RevIN mean
            pltpu.VMEM((N, 1), jnp.float32),    # RevIN std
        ],
        compiler_params=pltpu.CompilerParams(
            dimension_semantics=("parallel", "arbitrary")),
    )(x_bnt, rp["revin_w"], rp["revin_b"], rp["A_in"], rp["b_in"],
      rp["A_soft"], rp["w1"], rp["b1"], rp["w2"], rp["b2"],
      rp["ln1_g"], rp["ln1_b"], rp["ln2_g"], rp["ln2_b"],
      rp["enc_norm_g"], rp["enc_norm_b"],
      rp["Wc"], rp["We"], rp["b_fc1"], rp["fc_w2"], rp["fc_b2"])

    return jnp.transpose(out, (0, 2, 1))            # (B, P, N)


# ----------------------------------------------------------------------------
# Pure-jnp f32 reference of the ORIGINAL (unfused) pipeline, for validation
# ----------------------------------------------------------------------------
def _ln_ref(x, g, b, eps=_LN_EPS):
    mu = jnp.mean(x, axis=-1, keepdims=True)
    var = jnp.mean((x - mu) ** 2, axis=-1, keepdims=True)
    return (x - mu) * jax.lax.rsqrt(var + eps) * g + b


def reference_forward(params, x, cfg):
    B, T, N = x.shape
    D, P = cfg["embed_size"], cfg["pred_len"]
    Th = T // 2
    mean = jnp.mean(x, axis=1, keepdims=True)
    std = jnp.sqrt(jnp.var(x, axis=1, keepdims=True) + _REVIN_EPS)
    xn = (x - mean) / std * params["revin_w"] + params["revin_b"]
    x_emb = jnp.transpose(xn, (0, 2, 1))[..., None] * params["embeddings"]   # (B,N,T,D)
    vec = jnp.transpose(x_emb, (0, 1, 3, 2))                                 # (B,N,D,T)
    cAB = jnp.einsum("bndt,tj->bndj", vec, params["M_dec"])                  # (B,N,D,2Th)
    h = cAB.reshape(B, N, D * 2 * Th) @ params["ot_w_in"] + params["ot_b_in"]
    for layer in params["enc_layers"]:
        A = jax.nn.softmax(layer["w_tok"], axis=-1)
        h = _ln_ref(h + jnp.einsum("mn,bnd->bmd", A, h), layer["ln1_g"], layer["ln1_b"])
        ff = _apply_act(h @ layer["w1"] + layer["b1"], cfg["activation"])
        ff = ff @ layer["w2"] + layer["b2"]
        h = _ln_ref(h + ff, layer["ln2_g"], layer["ln2_b"])
    h = _ln_ref(h, params["enc_norm_g"], params["enc_norm_b"])
    cab_out = h @ params["ot_w_out"] + params["ot_b_out"]
    rec = jnp.einsum("bndj,jt->bndt", cab_out.reshape(B, N, D, 2 * Th), params["M_rec"])
    x_fre = jnp.transpose(rec, (0, 1, 3, 2))                                 # (B,N,T,D)
    x_sum = x_fre + x_emb
    hf = jax.nn.gelu(x_sum.reshape(B, N, T * D) @ params["fc_w1"] + params["fc_b1"],
                     approximate=True)
    out = hf @ params["fc_w2"] + params["fc_b2"]                             # (B,N,P)
    out = jnp.transpose(out, (0, 2, 1))                                      # (B,P,N)
    out = (out - params["revin_b"]) / (params["revin_w"] + _DENORM_EPS)
    out = out * std + mean
    return out


# ----------------------------------------------------------------------------
if __name__ == "__main__":
    cfg = dict(
        seq_len=16,
        pred_len=8,
        enc_in=4,
        d_model=32,
        d_ff=32,
        embed_size=4,
        e_layers=2,
        dropout=0.0,
        activation="gelu",
    )

    key = jax.random.PRNGKey(0)
    kp, kx = jax.random.split(key)
    params = init_params(kp, cfg)
    run_params = prepare_params(params, cfg)

    B = 2
    x = jax.random.normal(kx, (B, cfg["seq_len"], cfg["enc_in"]), jnp.float32)

    fwd = jax.jit(functools.partial(model_forward, cfg=cfg))
    out = jax.block_until_ready(fwd(run_params, x))

    assert out.shape == (B, cfg["pred_len"], cfg["enc_in"]), out.shape
    assert bool(jnp.all(jnp.isfinite(out)))

    # validate Pallas (fully fused, bf16-MXU) path against the unfused f32 reference
    ref = reference_forward(params, x, cfg)
    max_err = float(jnp.max(jnp.abs(out - ref)))
    tol = 5e-2 + 5e-2 * float(jnp.max(jnp.abs(ref)))
    assert max_err < tol, (max_err, tol)

    print("KERNEL_OK")
</pallas_src>

<mosaic_0001>
module attributes {stable_mosaic.version = 11 : i64} {
  func.func @_fused_forward_kernel(%arg0: i32, %arg1: i32, %arg2: memref<1x4x16xf32, #tpu.memory_space<vmem>>, %arg3: memref<4x1xf32, #tpu.memory_space<vmem>>, %arg4: memref<4x1xf32, #tpu.memory_space<vmem>>, %arg5: memref<16x32xbf16, #tpu.memory_space<vmem>>, %arg6: memref<1x32xf32, #tpu.memory_space<vmem>>, %arg7: memref<1x4x4xbf16, #tpu.memory_space<vmem>>, %arg8: memref<1x32x32xbf16, #tpu.memory_space<vmem>>, %arg9: memref<1x1x32xf32, #tpu.memory_space<vmem>>, %arg10: memref<1x32x32xbf16, #tpu.memory_space<vmem>>, %arg11: memref<1x1x32xf32, #tpu.memory_space<vmem>>, %arg12: memref<1x1x32xf32, #tpu.memory_space<vmem>>, %arg13: memref<1x1x32xf32, #tpu.memory_space<vmem>>, %arg14: memref<1x1x32xf32, #tpu.memory_space<vmem>>, %arg15: memref<1x1x32xf32, #tpu.memory_space<vmem>>, %arg16: memref<1x32xf32, #tpu.memory_space<vmem>>, %arg17: memref<1x32xf32, #tpu.memory_space<vmem>>, %arg18: memref<32x32xbf16, #tpu.memory_space<vmem>>, %arg19: memref<16x32xbf16, #tpu.memory_space<vmem>>, %arg20: memref<1x32xf32, #tpu.memory_space<vmem>>, %arg21: memref<32x8xbf16, #tpu.memory_space<vmem>>, %arg22: memref<1x8xf32, #tpu.memory_space<vmem>>, %arg23: memref<1x4x8xf32, #tpu.memory_space<vmem>>, %arg24: memref<4x32xf32, #tpu.memory_space<vmem>>, %arg25: memref<4x16xbf16, #tpu.memory_space<vmem>>, %arg26: memref<4x1xf32, #tpu.memory_space<vmem>>, %arg27: memref<4x1xf32, #tpu.memory_space<vmem>>) attributes {dimension_semantics = [#tpu.dimension_semantics<parallel>, #tpu.dimension_semantics<arbitrary>], iteration_bounds = array<i64: 2, 2>, scalar_prefetch = 0 : i64, scratch_operands = 4 : i64, tpu.core_type = #tpu.core_type<tc>, window_params = [{transform_indices = @transform_0, window_bounds = array<i64: 1, 4, 16>}, {pipeline_mode = #tpu.pipeline_mode<synchronous>, transform_indices = @transform_1, window_bounds = array<i64: 4, 1>}, {pipeline_mode = #tpu.pipeline_mode<synchronous>, transform_indices = @transform_2, window_bounds = array<i64: 4, 1>}, {pipeline_mode = #tpu.pipeline_mode<synchronous>, transform_indices = @transform_3, window_bounds = array<i64: 16, 32>}, {pipeline_mode = #tpu.pipeline_mode<synchronous>, transform_indices = @transform_4, window_bounds = array<i64: 1, 32>}, {transform_indices = @transform_5, window_bounds = array<i64: 1, 4, 4>}, {transform_indices = @transform_6, window_bounds = array<i64: 1, 32, 32>}, {transform_indices = @transform_7, window_bounds = array<i64: 1, 1, 32>}, {transform_indices = @transform_8, window_bounds = array<i64: 1, 32, 32>}, {transform_indices = @transform_9, window_bounds = array<i64: 1, 1, 32>}, {transform_indices = @transform_10, window_bounds = array<i64: 1, 1, 32>}, {transform_indices = @transform_11, window_bounds = array<i64: 1, 1, 32>}, {transform_indices = @transform_12, window_bounds = array<i64: 1, 1, 32>}, {transform_indices = @transform_13, window_bounds = array<i64: 1, 1, 32>}, {pipeline_mode = #tpu.pipeline_mode<synchronous>, transform_indices = @transform_14, window_bounds = array<i64: 1, 32>}, {pipeline_mode = #tpu.pipeline_mode<synchronous>, transform_indices = @transform_15, window_bounds = array<i64: 1, 32>}, {pipeline_mode = #tpu.pipeline_mode<synchronous>, transform_indices = @transform_16, window_bounds = array<i64: 32, 32>}, {pipeline_mode = #tpu.pipeline_mode<synchronous>, transform_indices = @transform_17, window_bounds = array<i64: 16, 32>}, {pipeline_mode = #tpu.pipeline_mode<synchronous>, transform_indices = @transform_18, window_bounds = array<i64: 1, 32>}, {pipeline_mode = #tpu.pipeline_mode<synchronous>, transform_indices = @transform_19, window_bounds = array<i64: 32, 8>}, {pipeline_mode = #tpu.pipeline_mode<synchronous>, transform_indices = @transform_20, window_bounds = array<i64: 1, 8>}, {transform_indices = @transform_21, window_bounds = array<i64: 1, 4, 8>}]} {
    %c0_i32 = arith.constant 0 : i32
    %0 = arith.cmpi eq, %arg1, %c0_i32 : i32
    %1 = arith.extui %0 : i1 to i32
    %c0_i32_0 = arith.constant 0 : i32
    %2 = arith.cmpi ne, %1, %c0_i32_0 : i32
    scf.if %2 {
      %c0_48 = arith.constant 0 : index
      %c0_49 = arith.constant 0 : index
      %c0_50 = arith.constant 0 : index
      %95 = vector.load %arg2[%c0_48, %c0_49, %c0_50] : memref<1x4x16xf32, #tpu.memory_space<vmem>>, vector<1x4x16xf32>
      %96 = vector.shape_cast %95 : vector<1x4x16xf32> to vector<4x16xf32>
      %cst_51 = arith.constant dense<0.000000e+00> : vector<4xf32>
      %97 = vector.multi_reduction <add>, %96, %cst_51 [1] : vector<4x16xf32> to vector<4xf32>
      %98 = vector.shape_cast %97 : vector<4xf32> to vector<4x1xf32>
      %cst_52 = arith.constant 1.600000e+01 : f32
      %99 = vector.broadcast %cst_52 : f32 to vector<4x1xf32>
      %100 = arith.divf %98, %99 : vector<4x1xf32>
      %101 = vector.broadcast %100 : vector<4x1xf32> to vector<4x16xf32>
      %102 = arith.subf %96, %101 : vector<4x16xf32>
      %103 = arith.mulf %102, %102 : vector<4x16xf32>
      %cst_53 = arith.constant dense<0.000000e+00> : vector<4xf32>
      %104 = vector.multi_reduction <add>, %103, %cst_53 [1] : vector<4x16xf32> to vector<4xf32>
      %105 = vector.shape_cast %104 : vector<4xf32> to vector<4x1xf32>
      %cst_54 = arith.constant 1.600000e+01 : f32
      %106 = vector.broadcast %cst_54 : f32 to vector<4x1xf32>
      %107 = arith.divf %105, %106 : vector<4x1xf32>
      %cst_55 = arith.constant 9.99999974E-6 : f32
      %108 = vector.broadcast %cst_55 : f32 to vector<4x1xf32>
      %109 = arith.addf %107, %108 : vector<4x1xf32>
      %110 = math.sqrt %109 : vector<4x1xf32>
      %111 = vector.broadcast %100 : vector<4x1xf32> to vector<4x16xf32>
      %112 = arith.subf %96, %111 : vector<4x16xf32>
      %113 = vector.broadcast %110 : vector<4x1xf32> to vector<4x16xf32>
      %114 = arith.divf %112, %113 : vector<4x16xf32>
      %c0_56 = arith.constant 0 : index
      %c0_57 = arith.constant 0 : index
      %115 = vector.load %arg3[%c0_56, %c0_57] : memref<4x1xf32, #tpu.memory_space<vmem>>, vector<4x1xf32>
      %116 = vector.broadcast %115 : vector<4x1xf32> to vector<4x16xf32>
      %117 = arith.mulf %114, %116 : vector<4x16xf32>
      %c0_58 = arith.constant 0 : index
      %c0_59 = arith.constant 0 : index
      %118 = vector.load %arg4[%c0_58, %c0_59] : memref<4x1xf32, #tpu.memory_space<vmem>>, vector<4x1xf32>
      %119 = vector.broadcast %118 : vector<4x1xf32> to vector<4x16xf32>
      %120 = arith.addf %117, %119 : vector<4x16xf32>
      %c0_60 = arith.constant 0 : index
      %c0_61 = arith.constant 0 : index
      %121 = vector.load %arg26[%c0_60, %c0_61] : memref<4x1xf32, #tpu.memory_space<vmem>>, vector<4x1xf32>
      tpu.vector_store %arg26[%c0_60, %c0_61], %100 {strides = array<i32>} : memref<4x1xf32, #tpu.memory_space<vmem>>, vector<4x1xf32>,
      %c0_62 = arith.constant 0 : index
      %c0_63 = arith.constant 0 : index
      %122 = vector.load %arg27[%c0_62, %c0_63] : memref<4x1xf32, #tpu.memory_space<vmem>>, vector<4x1xf32>
      tpu.vector_store %arg27[%c0_62, %c0_63], %110 {strides = array<i32>} : memref<4x1xf32, #tpu.memory_space<vmem>>, vector<4x1xf32>,
      %123 = arith.truncf %120 : vector<4x16xf32> to vector<4x16xbf16>
      %c0_64 = arith.constant 0 : index
      %c0_65 = arith.constant 0 : index
      %124 = vector.load %arg25[%c0_64, %c0_65] : memref<4x16xbf16, #tpu.memory_space<vmem>>, vector<4x16xbf16>
      tpu.vector_store %arg25[%c0_64, %c0_65], %123 {strides = array<i32>} : memref<4x16xbf16, #tpu.memory_space<vmem>>, vector<4x16xbf16>,
      %c0_66 = arith.constant 0 : index
      %c0_67 = arith.constant 0 : index
      %125 = vector.load %arg5[%c0_66, %c0_67] : memref<16x32xbf16, #tpu.memory_space<vmem>>, vector<16x32xbf16>
      %cst_68 = arith.constant dense<0.000000e+00> : vector<4x32xf32>
      %126 = tpu.matmul %123, %125, %cst_68 {dimension_numbers = #tpu.dot_dimension_numbers<[1], [0], [0], [1], [0, 0, 1, 1], [], []>} : vector<4x16xbf16>, vector<16x32xbf16>, vector<4x32xf32> -> vector<4x32xf32>
      %c0_69 = arith.constant 0 : index
      %c0_70 = arith.constant 0 : index
      %127 = vector.load %arg6[%c0_69, %c0_70] : memref<1x32xf32, #tpu.memory_space<vmem>>, vector<1x32xf32>
      %128 = vector.broadcast %127 : vector<1x32xf32> to vector<4x32xf32>
      %129 = arith.addf %126, %128 : vector<4x32xf32>
      %c0_71 = arith.constant 0 : index
      %c0_72 = arith.constant 0 : index
      %130 = vector.load %arg24[%c0_71, %c0_72] : memref<4x32xf32, #tpu.memory_space<vmem>>, vector<4x32xf32>
      tpu.vector_store %arg24[%c0_71, %c0_72], %129 {strides = array<i32>} : memref<4x32xf32, #tpu.memory_space<vmem>>, vector<4x32xf32>,
    } else {
    }
    %c0 = arith.constant 0 : index
    %c0_1 = arith.constant 0 : index
    %3 = vector.load %arg24[%c0, %c0_1] : memref<4x32xf32, #tpu.memory_space<vmem>>, vector<4x32xf32>
    %c0_2 = arith.constant 0 : index
    %c0_3 = arith.constant 0 : index
    %c0_4 = arith.constant 0 : index
    %4 = vector.load %arg7[%c0_2, %c0_3, %c0_4] : memref<1x4x4xbf16, #tpu.memory_space<vmem>>, vector<1x4x4xbf16>
    %5 = vector.shape_cast %4 : vector<1x4x4xbf16> to vector<4x4xbf16>
    %6 = arith.truncf %3 : vector<4x32xf32> to vector<4x32xbf16>
    %cst = arith.constant dense<0.000000e+00> : vector<4x32xf32>
    %7 = tpu.matmul %5, %6, %cst {dimension_numbers = #tpu.dot_dimension_numbers<[1], [0], [0], [1], [0, 0, 1, 1], [], []>} : vector<4x4xbf16>, vector<4x32xbf16>, vector<4x32xf32> -> vector<4x32xf32>
    %8 = arith.addf %3, %7 : vector<4x32xf32>
    %cst_5 = arith.constant dense<0.000000e+00> : vector<4xf32>
    %9 = vector.multi_reduction <add>, %8, %cst_5 [1] : vector<4x32xf32> to vector<4xf32>
    %10 = vector.shape_cast %9 : vector<4xf32> to vector<4x1xf32>
    %cst_6 = arith.constant 3.200000e+01 : f32
    %11 = vector.broadcast %cst_6 : f32 to vector<4x1xf32>
    %12 = arith.divf %10, %11 : vector<4x1xf32>
    %13 = vector.broadcast %12 : vector<4x1xf32> to vector<4x32xf32>
    %14 = arith.subf %8, %13 : vector<4x32xf32>
    %15 = arith.mulf %14, %14 : vector<4x32xf32>
    %cst_7 = arith.constant dense<0.000000e+00> : vector<4xf32>
    %16 = vector.multi_reduction <add>, %15, %cst_7 [1] : vector<4x32xf32> to vector<4xf32>
    %17 = vector.shape_cast %16 : vector<4xf32> to vector<4x1xf32>
    %cst_8 = arith.constant 3.200000e+01 : f32
    %18 = vector.broadcast %cst_8 : f32 to vector<4x1xf32>
    %19 = arith.divf %17, %18 : vector<4x1xf32>
    %20 = vector.broadcast %12 : vector<4x1xf32> to vector<4x32xf32>
    %21 = arith.subf %8, %20 : vector<4x32xf32>
    %cst_9 = arith.constant 9.99999974E-6 : f32
    %22 = vector.broadcast %cst_9 : f32 to vector<4x1xf32>
    %23 = arith.addf %19, %22 : vector<4x1xf32>
    %24 = math.rsqrt %23 : vector<4x1xf32>
    %25 = vector.broadcast %24 : vector<4x1xf32> to vector<4x32xf32>
    %26 = arith.mulf %21, %25 : vector<4x32xf32>
    %c0_10 = arith.constant 0 : index
    %c0_11 = arith.constant 0 : index
    %c0_12 = arith.constant 0 : index
    %27 = vector.load %arg12[%c0_10, %c0_11, %c0_12] : memref<1x1x32xf32, #tpu.memory_space<vmem>>, vector<1x1x32xf32>
    %28 = vector.shape_cast %27 : vector<1x1x32xf32> to vector<1x32xf32>
    %29 = vector.broadcast %28 : vector<1x32xf32> to vector<4x32xf32>
    %30 = arith.mulf %26, %29 : vector<4x32xf32>
    %c0_13 = arith.constant 0 : index
    %c0_14 = arith.constant 0 : index
    %c0_15 = arith.constant 0 : index
    %31 = vector.load %arg13[%c0_13, %c0_14, %c0_15] : memref<1x1x32xf32, #tpu.memory_space<vmem>>, vector<1x1x32xf32>
    %32 = vector.shape_cast %31 : vector<1x1x32xf32> to vector<1x32xf32>
    %33 = vector.broadcast %32 : vector<1x32xf32> to vector<4x32xf32>
    %34 = arith.addf %30, %33 : vector<4x32xf32>
    %35 = arith.truncf %34 : vector<4x32xf32> to vector<4x32xbf16>
    %c0_16 = arith.constant 0 : index
    %c0_17 = arith.constant 0 : index
    %c0_18 = arith.constant 0 : index
    %36 = vector.load %arg8[%c0_16, %c0_17, %c0_18] : memref<1x32x32xbf16, #tpu.memory_space<vmem>>, vector<1x32x32xbf16>
    %37 = vector.shape_cast %36 : vector<1x32x32xbf16> to vector<32x32xbf16>
    %cst_19 = arith.constant dense<0.000000e+00> : vector<4x32xf32>
    %38 = tpu.matmul %35, %37, %cst_19 {dimension_numbers = #tpu.dot_dimension_numbers<[1], [0], [0], [1], [0, 0, 1, 1], [], []>} : vector<4x32xbf16>, vector<32x32xbf16>, vector<4x32xf32> -> vector<4x32xf32>
    %c0_20 = arith.constant 0 : index
    %c0_21 = arith.constant 0 : index
    %c0_22 = arith.constant 0 : index
    %39 = vector.load %arg9[%c0_20, %c0_21, %c0_22] : memref<1x1x32xf32, #tpu.memory_space<vmem>>, vector<1x1x32xf32>
    %40 = vector.shape_cast %39 : vector<1x1x32xf32> to vector<1x32xf32>
    %41 = vector.broadcast %40 : vector<1x32xf32> to vector<4x32xf32>
    %42 = arith.addf %38, %41 : vector<4x32xf32>
    %43 = arith.mulf %42, %42 : vector<4x32xf32>
    %44 = arith.mulf %42, %43 : vector<4x32xf32>
    %cst_23 = arith.constant 4.471500e-02 : f32
    %45 = vector.broadcast %cst_23 : f32 to vector<4x32xf32>
    %46 = arith.mulf %45, %44 : vector<4x32xf32>
    %47 = arith.addf %42, %46 : vector<4x32xf32>
    %cst_24 = arith.constant 0.797884583 : f32
    %48 = vector.broadcast %cst_24 : f32 to vector<4x32xf32>
    %49 = arith.mulf %48, %47 : vector<4x32xf32>
    %50 = math.tanh %49 : vector<4x32xf32>
    %cst_25 = arith.constant 1.000000e+00 : f32
    %51 = vector.broadcast %cst_25 : f32 to vector<4x32xf32>
    %52 = arith.addf %51, %50 : vector<4x32xf32>
    %cst_26 = arith.constant 5.000000e-01 : f32
    %53 = vector.broadcast %cst_26 : f32 to vector<4x32xf32>
    %54 = arith.mulf %53, %52 : vector<4x32xf32>
    %55 = arith.mulf %42, %54 : vector<4x32xf32>
    %56 = arith.truncf %55 : vector<4x32xf32> to vector<4x32xbf16>
    %c0_27 = arith.constant 0 : index
    %c0_28 = arith.constant 0 : index
    %c0_29 = arith.constant 0 : index
    %57 = vector.load %arg10[%c0_27, %c0_28, %c0_29] : memref<1x32x32xbf16, #tpu.memory_space<vmem>>, vector<1x32x32xbf16>
    %58 = vector.shape_cast %57 : vector<1x32x32xbf16> to vector<32x32xbf16>
    %cst_30 = arith.constant dense<0.000000e+00> : vector<4x32xf32>
    %59 = tpu.matmul %56, %58, %cst_30 {dimension_numbers = #tpu.dot_dimension_numbers<[1], [0], [0], [1], [0, 0, 1, 1], [], []>} : vector<4x32xbf16>, vector<32x32xbf16>, vector<4x32xf32> -> vector<4x32xf32>
    %c0_31 = arith.constant 0 : index
    %c0_32 = arith.constant 0 : index
    %c0_33 = arith.constant 0 : index
    %60 = vector.load %arg11[%c0_31, %c0_32, %c0_33] : memref<1x1x32xf32, #tpu.memory_space<vmem>>, vector<1x1x32xf32>
    %61 = vector.shape_cast %60 : vector<1x1x32xf32> to vector<1x32xf32>
    %62 = vector.broadcast %61 : vector<1x32xf32> to vector<4x32xf32>
    %63 = arith.addf %59, %62 : vector<4x32xf32>
    %64 = arith.addf %34, %63 : vector<4x32xf32>
    %cst_34 = arith.constant dense<0.000000e+00> : vector<4xf32>
    %65 = vector.multi_reduction <add>, %64, %cst_34 [1] : vector<4x32xf32> to vector<4xf32>
    %66 = vector.shape_cast %65 : vector<4xf32> to vector<4x1xf32>
    %cst_35 = arith.constant 3.200000e+01 : f32
    %67 = vector.broadcast %cst_35 : f32 to vector<4x1xf32>
    %68 = arith.divf %66, %67 : vector<4x1xf32>
    %69 = vector.broadcast %68 : vector<4x1xf32> to vector<4x32xf32>
    %70 = arith.subf %64, %69 : vector<4x32xf32>
    %71 = arith.mulf %70, %70 : vector<4x32xf32>
    %cst_36 = arith.constant dense<0.000000e+00> : vector<4xf32>
    %72 = vector.multi_reduction <add>, %71, %cst_36 [1] : vector<4x32xf32> to vector<4xf32>
    %73 = vector.shape_cast %72 : vector<4xf32> to vector<4x1xf32>
    %cst_37 = arith.constant 3.200000e+01 : f32
    %74 = vector.broadcast %cst_37 : f32 to vector<4x1xf32>
    %75 = arith.divf %73, %74 : vector<4x1xf32>
    %76 = vector.broadcast %68 : vector<4x1xf32> to vector<4x32xf32>
    %77 = arith.subf %64, %76 : vector<4x32xf32>
    %cst_38 = arith.constant 9.99999974E-6 : f32
    %78 = vector.broadcast %cst_38 : f32 to vector<4x1xf32>
    %79 = arith.addf %75, %78 : vector<4x1xf32>
    %80 = math.rsqrt %79 : vector<4x1xf32>
    %81 = vector.broadcast %80 : vector<4x1xf32> to vector<4x32xf32>
    %82 = arith.mulf %77, %81 : vector<4x32xf32>
    %c0_39 = arith.constant 0 : index
    %c0_40 = arith.constant 0 : index
    %c0_41 = arith.constant 0 : index
    %83 = vector.load %arg14[%c0_39, %c0_40, %c0_41] : memref<1x1x32xf32, #tpu.memory_space<vmem>>, vector<1x1x32xf32>
    %84 = vector.shape_cast %83 : vector<1x1x32xf32> to vector<1x32xf32>
    %85 = vector.broadcast %84 : vector<1x32xf32> to vector<4x32xf32>
    %86 = arith.mulf %82, %85 : vector<4x32xf32>
    %c0_42 = arith.constant 0 : index
    %c0_43 = arith.constant 0 : index
    %c0_44 = arith.constant 0 : index
    %87 = vector.load %arg15[%c0_42, %c0_43, %c0_44] : memref<1x1x32xf32, #tpu.memory_space<vmem>>, vector<1x1x32xf32>
    %88 = vector.shape_cast %87 : vector<1x1x32xf32> to vector<1x32xf32>
    %89 = vector.broadcast %88 : vector<1x32xf32> to vector<4x32xf32>
    %90 = arith.addf %86, %89 : vector<4x32xf32>
    %c0_45 = arith.constant 0 : index
    %c0_46 = arith.constant 0 : index
    %91 = vector.load %arg24[%c0_45, %c0_46] : memref<4x32xf32, #tpu.memory_space<vmem>>, vector<4x32xf32>
    tpu.vector_store %arg24[%c0_45, %c0_46], %90 {strides = array<i32>} : memref<4x32xf32, #tpu.memory_space<vmem>>, vector<4x32xf32>,
    %c1_i32 = arith.constant 1 : i32
    %92 = arith.cmpi eq, %arg1, %c1_i32 : i32
    %93 = arith.extui %92 : i1 to i32
    %c0_i32_47 = arith.constant 0 : i32
    %94 = arith.cmpi ne, %93, %c0_i32_47 : i32
    scf.if %94 {
      %cst_48 = arith.constant dense<0.000000e+00> : vector<4xf32>
      %95 = vector.multi_reduction <add>, %90, %cst_48 [1] : vector<4x32xf32> to vector<4xf32>
      %96 = vector.shape_cast %95 : vector<4xf32> to vector<4x1xf32>
      %cst_49 = arith.constant 3.200000e+01 : f32
      %97 = vector.broadcast %cst_49 : f32 to vector<4x1xf32>
      %98 = arith.divf %96, %97 : vector<4x1xf32>
      %99 = vector.broadcast %98 : vector<4x1xf32> to vector<4x32xf32>
      %100 = arith.subf %90, %99 : vector<4x32xf32>
      %101 = arith.mulf %100, %100 : vector<4x32xf32>
      %cst_50 = arith.constant dense<0.000000e+00> : vector<4xf32>
      %102 = vector.multi_reduction <add>, %101, %cst_50 [1] : vector<4x32xf32> to vector<4xf32>
      %103 = vector.shape_cast %102 : vector<4xf32> to vector<4x1xf32>
      %cst_51 = arith.constant 3.200000e+01 : f32
      %104 = vector.broadcast %cst_51 : f32 to vector<4x1xf32>
      %105 = arith.divf %103, %104 : vector<4x1xf32>
      %106 = vector.broadcast %98 : vector<4x1xf32> to vector<4x32xf32>
      %107 = arith.subf %90, %106 : vector<4x32xf32>
      %cst_52 = arith.constant 9.99999974E-6 : f32
      %108 = vector.broadcast %cst_52 : f32 to vector<4x1xf32>
      %109 = arith.addf %105, %108 : vector<4x1xf32>
      %110 = math.rsqrt %109 : vector<4x1xf32>
      %111 = vector.broadcast %110 : vector<4x1xf32> to vector<4x32xf32>
      %112 = arith.mulf %107, %111 : vector<4x32xf32>
      %c0_53 = arith.constant 0 : index
      %c0_54 = arith.constant 0 : index
      %113 = vector.load %arg16[%c0_53, %c0_54] : memref<1x32xf32, #tpu.memory_space<vmem>>, vector<1x32xf32>
      %114 = vector.broadcast %113 : vector<1x32xf32> to vector<4x32xf32>
      %115 = arith.mulf %112, %114 : vector<4x32xf32>
      %c0_55 = arith.constant 0 : index
      %c0_56 = arith.constant 0 : index
      %116 = vector.load %arg17[%c0_55, %c0_56] : memref<1x32xf32, #tpu.memory_space<vmem>>, vector<1x32xf32>
      %117 = vector.broadcast %116 : vector<1x32xf32> to vector<4x32xf32>
      %118 = arith.addf %115, %117 : vector<4x32xf32>
      %119 = arith.truncf %118 : vector<4x32xf32> to vector<4x32xbf16>
      %c0_57 = arith.constant 0 : index
      %c0_58 = arith.constant 0 : index
      %120 = vector.load %arg18[%c0_57, %c0_58] : memref<32x32xbf16, #tpu.memory_space<vmem>>, vector<32x32xbf16>
      %cst_59 = arith.constant dense<0.000000e+00> : vector<4x32xf32>
      %121 = tpu.matmul %119, %120, %cst_59 {dimension_numbers = #tpu.dot_dimension_numbers<[1], [0], [0], [1], [0, 0, 1, 1], [], []>} : vector<4x32xbf16>, vector<32x32xbf16>, vector<4x32xf32> -> vector<4x32xf32>
      %c0_60 = arith.constant 0 : index
      %c0_61 = arith.constant 0 : index
      %122 = vector.load %arg25[%c0_60, %c0_61] : memref<4x16xbf16, #tpu.memory_space<vmem>>, vector<4x16xbf16>
      %c0_62 = arith.constant 0 : index
      %c0_63 = arith.constant 0 : index
      %123 = vector.load %arg19[%c0_62, %c0_63] : memref<16x32xbf16, #tpu.memory_space<vmem>>, vector<16x32xbf16>
      %cst_64 = arith.constant dense<0.000000e+00> : vector<4x32xf32>
      %124 = tpu.matmul %122, %123, %cst_64 {dimension_numbers = #tpu.dot_dimension_numbers<[1], [0], [0], [1], [0, 0, 1, 1], [], []>} : vector<4x16xbf16>, vector<16x32xbf16>, vector<4x32xf32> -> vector<4x32xf32>
      %125 = arith.addf %121, %124 : vector<4x32xf32>
      %c0_65 = arith.constant 0 : index
      %c0_66 = arith.constant 0 : index
      %126 = vector.load %arg20[%c0_65, %c0_66] : memref<1x32xf32, #tpu.memory_space<vmem>>, vector<1x32xf32>
      %127 = vector.broadcast %126 : vector<1x32xf32> to vector<4x32xf32>
      %128 = arith.addf %125, %127 : vector<4x32xf32>
      %129 = arith.mulf %128, %128 : vector<4x32xf32>
      %130 = arith.mulf %128, %129 : vector<4x32xf32>
      %cst_67 = arith.constant 4.471500e-02 : f32
      %131 = vector.broadcast %cst_67 : f32 to vector<4x32xf32>
      %132 = arith.mulf %131, %130 : vector<4x32xf32>
      %133 = arith.addf %128, %132 : vector<4x32xf32>
      %cst_68 = arith.constant 0.797884583 : f32
      %134 = vector.broadcast %cst_68 : f32 to vector<4x32xf32>
      %135 = arith.mulf %134, %133 : vector<4x32xf32>
      %136 = math.tanh %135 : vector<4x32xf32>
      %cst_69 = arith.constant 1.000000e+00 : f32
      %137 = vector.broadcast %cst_69 : f32 to vector<4x32xf32>
      %138 = arith.addf %137, %136 : vector<4x32xf32>
      %cst_70 = arith.constant 5.000000e-01 : f32
      %139 = vector.broadcast %cst_70 : f32 to vector<4x32xf32>
      %140 = arith.mulf %139, %138 : vector<4x32xf32>
      %141 = arith.mulf %128, %140 : vector<4x32xf32>
      %142 = arith.truncf %141 : vector<4x32xf32> to vector<4x32xbf16>
      %c0_71 = arith.constant 0 : index
      %c0_72 = arith.constant 0 : index
      %143 = vector.load %arg21[%c0_71, %c0_72] : memref<32x8xbf16, #tpu.memory_space<vmem>>, vector<32x8xbf16>
      %cst_73 = arith.constant dense<0.000000e+00> : vector<4x8xf32>
      %144 = tpu.matmul %142, %143, %cst_73 {dimension_numbers = #tpu.dot_dimension_numbers<[1], [0], [0], [1], [0, 0, 1, 1], [], []>} : vector<4x32xbf16>, vector<32x8xbf16>, vector<4x8xf32> -> vector<4x8xf32>
      %c0_74 = arith.constant 0 : index
      %c0_75 = arith.constant 0 : index
      %145 = vector.load %arg22[%c0_74, %c0_75] : memref<1x8xf32, #tpu.memory_space<vmem>>, vector<1x8xf32>
      %146 = vector.broadcast %145 : vector<1x8xf32> to vector<4x8xf32>
      %147 = arith.addf %144, %146 : vector<4x8xf32>
      %c0_76 = arith.constant 0 : index
      %c0_77 = arith.constant 0 : index
      %148 = vector.load %arg4[%c0_76, %c0_77] : memref<4x1xf32, #tpu.memory_space<vmem>>, vector<4x1xf32>
      %149 = vector.broadcast %148 : vector<4x1xf32> to vector<4x8xf32>
      %150 = arith.subf %147, %149 : vector<4x8xf32>
      %c0_78 = arith.constant 0 : index
      %c0_79 = arith.constant 0 : index
      %151 = vector.load %arg3[%c0_78, %c0_79] : memref<4x1xf32, #tpu.memory_space<vmem>>, vector<4x1xf32>
      %cst_80 = arith.constant 1.000000e-10 : f32
      %152 = vector.broadcast %cst_80 : f32 to vector<4x1xf32>
      %153 = arith.addf %151, %152 : vector<4x1xf32>
      %154 = vector.broadcast %153 : vector<4x1xf32> to vector<4x8xf32>
      %155 = arith.divf %150, %154 : vector<4x8xf32>
      %c0_81 = arith.constant 0 : index
      %c0_82 = arith.constant 0 : index
      %156 = vector.load %arg27[%c0_81, %c0_82] : memref<4x1xf32, #tpu.memory_space<vmem>>, vector<4x1xf32>
      %157 = vector.broadcast %156 : vector<4x1xf32> to vector<4x8xf32>
      %158 = arith.mulf %155, %157 : vector<4x8xf32>
      %c0_83 = arith.constant 0 : index
      %c0_84 = arith.constant 0 : index
      %159 = vector.load %arg26[%c0_83, %c0_84] : memref<4x1xf32, #tpu.memory_space<vmem>>, vector<4x1xf32>
      %160 = vector.broadcast %159 : vector<4x1xf32> to vector<4x8xf32>
      %161 = arith.addf %158, %160 : vector<4x8xf32>
      %c0_85 = arith.constant 0 : index
      %c0_86 = arith.constant 0 : index
      %c0_87 = arith.constant 0 : index
      %162 = vector.load %arg23[%c0_85, %c0_86, %c0_87] : memref<1x4x8xf32, #tpu.memory_space<vmem>>, vector<1x4x8xf32>
      %163 = vector.shape_cast %162 : vector<1x4x8xf32> to vector<4x8xf32>
      %164 = vector.shape_cast %161 : vector<4x8xf32> to vector<1x4x8xf32>
      tpu.vector_store %arg23[%c0_85, %c0_86, %c0_87], %164 {strides = array<i32>} : memref<1x4x8xf32, #tpu.memory_space<vmem>>, vector<1x4x8xf32>,
    } else {
    }
    return
  }
  func.func @transform_0(%arg0: i32, %arg1: i32) -> (i32, i32, i32) {
    %c0_i32 = arith.constant 0 : i32
    %c0_i32_0 = arith.constant 0 : i32
    %c0_i32_1 = arith.constant 0 : i32
    return %arg0, %c0_i32, %c0_i32_0 : i32, i32, i32
  }
  func.func @transform_1(%arg0: i32, %arg1: i32) -> (i32, i32) {
    %c0_i32 = arith.constant 0 : i32
    %c0_i32_0 = arith.constant 0 : i32
    %c0_i32_1 = arith.constant 0 : i32
    return %c0_i32, %c0_i32_0 : i32, i32
  }
  func.func @transform_2(%arg0: i32, %arg1: i32) -> (i32, i32) {
    %c0_i32 = arith.constant 0 : i32
    %c0_i32_0 = arith.constant 0 : i32
    %c0_i32_1 = arith.constant 0 : i32
    return %c0_i32, %c0_i32_0 : i32, i32
  }
  func.func @transform_3(%arg0: i32, %arg1: i32) -> (i32, i32) {
    %c0_i32 = arith.constant 0 : i32
    %c0_i32_0 = arith.constant 0 : i32
    %c0_i32_1 = arith.constant 0 : i32
    return %c0_i32, %c0_i32_0 : i32, i32
  }
  func.func @transform_4(%arg0: i32, %arg1: i32) -> (i32, i32) {
    %c0_i32 = arith.constant 0 : i32
    %c0_i32_0 = arith.constant 0 : i32
    %c0_i32_1 = arith.constant 0 : i32
    return %c0_i32, %c0_i32_0 : i32, i32
  }
  func.func @transform_5(%arg0: i32, %arg1: i32) -> (i32, i32, i32) {
    %c0_i32 = arith.constant 0 : i32
    %c0_i32_0 = arith.constant 0 : i32
    %c0_i32_1 = arith.constant 0 : i32
    return %arg1, %c0_i32, %c0_i32_0 : i32, i32, i32
  }
  func.func @transform_6(%arg0: i32, %arg1: i32) -> (i32, i32, i32) {
    %c0_i32 = arith.constant 0 : i32
    %c0_i32_0 = arith.constant 0 : i32
    %c0_i32_1 = arith.constant 0 : i32
    return %arg1, %c0_i32, %c0_i32_0 : i32, i32, i32
  }
  func.func @transform_7(%arg0: i32, %arg1: i32) -> (i32, i32, i32) {
    %c0_i32 = arith.constant 0 : i32
    %c0_i32_0 = arith.constant 0 : i32
    %c0_i32_1 = arith.constant 0 : i32
    return %arg1, %c0_i32, %c0_i32_0 : i32, i32, i32
  }
  func.func @transform_8(%arg0: i32, %arg1: i32) -> (i32, i32, i32) {
    %c0_i32 = arith.constant 0 : i32
    %c0_i32_0 = arith.constant 0 : i32
    %c0_i32_1 = arith.constant 0 : i32
    return %arg1, %c0_i32, %c0_i32_0 : i32, i32, i32
  }
  func.func @transform_9(%arg0: i32, %arg1: i32) -> (i32, i32, i32) {
    %c0_i32 = arith.constant 0 : i32
    %c0_i32_0 = arith.constant 0 : i32
    %c0_i32_1 = arith.constant 0 : i32
    return %arg1, %c0_i32, %c0_i32_0 : i32, i32, i32
  }
  func.func @transform_10(%arg0: i32, %arg1: i32) -> (i32, i32, i32) {
    %c0_i32 = arith.constant 0 : i32
    %c0_i32_0 = arith.constant 0 : i32
    %c0_i32_1 = arith.constant 0 : i32
    return %arg1, %c0_i32, %c0_i32_0 : i32, i32, i32
  }
  func.func @transform_11(%arg0: i32, %arg1: i32) -> (i32, i32, i32) {
    %c0_i32 = arith.constant 0 : i32
    %c0_i32_0 = arith.constant 0 : i32
    %c0_i32_1 = arith.constant 0 : i32
    return %arg1, %c0_i32, %c0_i32_0 : i32, i32, i32
  }
  func.func @transform_12(%arg0: i32, %arg1: i32) -> (i32, i32, i32) {
    %c0_i32 = arith.constant 0 : i32
    %c0_i32_0 = arith.constant 0 : i32
    %c0_i32_1 = arith.constant 0 : i32
    return %arg1, %c0_i32, %c0_i32_0 : i32, i32, i32
  }
  func.func @transform_13(%arg0: i32, %arg1: i32) -> (i32, i32, i32) {
    %c0_i32 = arith.constant 0 : i32
    %c0_i32_0 = arith.constant 0 : i32
    %c0_i32_1 = arith.constant 0 : i32
    return %arg1, %c0_i32, %c0_i32_0 : i32, i32, i32
  }
  func.func @transform_14(%arg0: i32, %arg1: i32) -> (i32, i32) {
    %c0_i32 = arith.constant 0 : i32
    %c0_i32_0 = arith.constant 0 : i32
    %c0_i32_1 = arith.constant 0 : i32
    return %c0_i32, %c0_i32_0 : i32, i32
  }
  func.func @transform_15(%arg0: i32, %arg1: i32) -> (i32, i32) {
    %c0_i32 = arith.constant 0 : i32
    %c0_i32_0 = arith.constant 0 : i32
    %c0_i32_1 = arith.constant 0 : i32
    return %c0_i32, %c0_i32_0 : i32, i32
  }
  func.func @transform_16(%arg0: i32, %arg1: i32) -> (i32, i32) {
    %c0_i32 = arith.constant 0 : i32
    %c0_i32_0 = arith.constant 0 : i32
    %c0_i32_1 = arith.constant 0 : i32
    return %c0_i32, %c0_i32_0 : i32, i32
  }
  func.func @transform_17(%arg0: i32, %arg1: i32) -> (i32, i32) {
    %c0_i32 = arith.constant 0 : i32
    %c0_i32_0 = arith.constant 0 : i32
    %c0_i32_1 = arith.constant 0 : i32
    return %c0_i32, %c0_i32_0 : i32, i32
  }
  func.func @transform_18(%arg0: i32, %arg1: i32) -> (i32, i32) {
    %c0_i32 = arith.constant 0 : i32
    %c0_i32_0 = arith.constant 0 : i32
    %c0_i32_1 = arith.constant 0 : i32
    return %c0_i32, %c0_i32_0 : i32, i32
  }
  func.func @transform_19(%arg0: i32, %arg1: i32) -> (i32, i32) {
    %c0_i32 = arith.constant 0 : i32
    %c0_i32_0 = arith.constant 0 : i32
    %c0_i32_1 = arith.constant 0 : i32
    return %c0_i32, %c0_i32_0 : i32, i32
  }
  func.func @transform_20(%arg0: i32, %arg1: i32) -> (i32, i32) {
    %c0_i32 = arith.constant 0 : i32
    %c0_i32_0 = arith.constant 0 : i32
    %c0_i32_1 = arith.constant 0 : i32
    return %c0_i32, %c0_i32_0 : i32, i32
  }
  func.func @transform_21(%arg0: i32, %arg1: i32) -> (i32, i32, i32) {
    %c0_i32 = arith.constant 0 : i32
    %c0_i32_0 = arith.constant 0 : i32
    %c0_i32_1 = arith.constant 0 : i32
    return %arg0, %c0_i32, %c0_i32_0 : i32, i32, i32
  }
}

</mosaic_0001>

<bundles_post_ra>
// kernel: model_forward.1
= control target key start
LH: loop header
LB: loop body
LE: loop exit
PB: predicated region body
PF: predicated region fallthrough
CT: control target
= control target key end

     0   :  { %s3339_s0 = inlined_call_operand.vmem [shape: f32[2,4,16], index: 0, kind: input, shape index: {}]   ;;  %s3340_s1 = inlined_call_operand.vmem [shape: f32[4,1], index: 1, kind: input, shape index: {}]   ;;  %s3341_s2 = inlined_call_operand.vmem [shape: f32[4,1], index: 2, kind: input, shape index: {}]   ;;  %s3342_s3 = inlined_call_operand.hbm [shape: bf16[16,32], index: 3, kind: input, shape index: {}]   ;;  %s3343_s4 = inlined_call_operand.hbm [shape: f32[1,32], index: 4, kind: input, shape index: {}]   ;;  %s3344_s5 = inlined_call_operand.hbm [shape: bf16[2,4,4], index: 5, kind: input, shape index: {}]   ;;  %s3345_s6 = inlined_call_operand.vmem [shape: bf16[2,32,32], index: 6, kind: input, shape index: {}]   ;;  %s3346_s7 = inlined_call_operand.hbm [shape: f32[2,1,32], index: 7, kind: input, shape index: {}]   ;;  %s3347_s8 = inlined_call_operand.vmem [shape: bf16[2,32,32], index: 8, kind: input, shape index: {}]   ;;  %s3348_s9 = inlined_call_operand.hbm [shape: f32[2,1,32], index: 9, kind: input, shape index: {}]   ;;  %s3349_s10 = inlined_call_operand.vmem [shape: f32[2,1,32], index: 10, kind: input, shape index: {}]   ;;  %s3350_s11 = inlined_call_operand.vmem [shape: f32[2,1,32], index: 11, kind: input, shape index: {}]   ;;  %s3351_s12 = inlined_call_operand.vmem [shape: f32[2,1,32], index: 12, kind: input, shape index: {}]   ;;  %s3352_s13 = inlined_call_operand.vmem [shape: f32[2,1,32], index: 13, kind: input, shape index: {}]   ;;  %s3353_s14 = inlined_call_operand.vmem [shape: f32[1,32], index: 14, kind: input, shape index: {}]   ;;  %s3354_s15 = inlined_call_operand.hbm [shape: f32[1,32], index: 15, kind: input, shape index: {}]   ;;  %s3355_s16 = inlined_call_operand.hbm [shape: bf16[32,32], index: 16, kind: input, shape index: {}]   ;;  %s3356_s17 = inlined_call_operand.hbm [shape: bf16[16,32], index: 17, kind: input, shape index: {}]   ;;  %s3357_s18 = inlined_call_operand.hbm [shape: f32[1,32], index: 18, kind: input, shape index: {}]   ;;  %s3358_s19 = inlined_call_operand.vmem [shape: bf16[32,8], index: 19, kind: input, shape index: {}]   ;;  %s3359_s20 = inlined_call_operand.hbm [shape: f32[1,8], index: 20, kind: input, shape index: {}]   ;;  %s3360_s21 = inlined_call_operand.hbm [shape: f32[2,4,8], index: 21, kind: output, shape index: {}]  }
   0x1   :  { %3408 = sst [smem:[#allocation45_spill]] %s3339_s0 }
   0x2   :  { %3409 = sst [smem:[#allocation46_spill]] %s3340_s1 }
   0x3   :  { %3410 = sst [smem:[#allocation47_spill]] %s3341_s2 }
   0x4   :  { %3411 = sst [smem:[#allocation48_spill]] %s3342_s3 }
   0x5   :  { %3412 = sst [smem:[#allocation49_spill]] %s3343_s4 }
   0x6   :  { %3413 = sst [smem:[#allocation50_spill]] %s3344_s5 }
   0x7   :  { %3414 = sst [smem:[#allocation51_spill]] %s3345_s6 }
   0x8   :  { %3415 = sst [smem:[#allocation52_spill]] %s3346_s7 }
   0x9   :  { %3416 = sst [smem:[#allocation53_spill]] %s3347_s8 }
   0xa   :  { %3417 = sst [smem:[#allocation54_spill]] %s3348_s9 }
   0xb   :  { %3418 = sst [smem:[#allocation55_spill]] %s3349_s10 }
   0xc   :  { %3419 = sst [smem:[#allocation56_spill]] %s3350_s11 }
   0xd   :  { %3420 = sst [smem:[#allocation57_spill]] %s3351_s12 }
   0xe   :  { %3421 = sst [smem:[#allocation58_spill]] %s3352_s13 }
   0xf   :  { %3422 = sst [smem:[#allocation59_spill]] %s3353_s14 }
  0x10   :  { %3423 = sst [smem:[#allocation60_spill]] %s3354_s15 }
  0x11   :  { %3424 = sst [smem:[#allocation61_spill]] %s3355_s16 }
  0x12   :  { %3425 = sst [smem:[#allocation62_spill]] %s3356_s17 }
  0x13   :  { %3426 = sst [smem:[#allocation63_spill]] %s3357_s18 }
  0x14   :  { %3427 = sst [smem:[#allocation64_spill]] %s3358_s19 }
  0x15   :  { %3428 = sst [smem:[#allocation65_spill]] %s3360_s21 }
  0x16   :  { %26 = vsyncpa [#allocation7], 0 }
  0x17   :  { %27 = vsyncpa [#allocation10], 0 }
  0x18   :  { %28 = vsyncpa [#allocation16], 0 }
  0x19   :  { %29 = vsyncpa [#allocation19], 0 }
  0x1a   :  { %30 = vsyncpa [#allocation8], 0 }
  0x1b   :  { %32 = vsyncpa [#allocation8 + $0x1], 0  ;;  %s2764_s2 = smov 0   ;;  %s2766_s25 = smov 0  }
  0x1c   :  { %s2768_s26 = smov 0   ;;  %s2770_s27 = smov 0  }
  0x1d   :  { %s2772_s3 = smov 0   ;;  %s2774_s28 = smov 0  }
  0x1e   :  { %s2776_s29 = smov 0   ;;  %s2778_s0 = smov 0  }
  0x1f   :  { %s2780_s4 = smov 0   ;;  %s2782_s30 = smov 0  }
  0x20   :  { %s2784_s5 = smov 0  }
  0x21 LB: > { %3429 = sst [smem:[#allocation29_spill]] %s2591_s2  ;;  %s2820_s22 = sadd.s32 4294967295, %s2631_s5   ;;  %s2631_s5 = sphi %s2784_s5, %s38_s5   ;;  %s2627_s30 = sphi %s2782_s30, %s3531_s30   ;;  %s2623_s4 = sphi %s2780_s4, %s3533_s4   ;;  %s2619_s0 = sphi %s2778_s0, %s3529_s0   ;;  %s2615_s29 = sphi %s2776_s29, %s3532_s29   ;;  %s2611_s28 = sphi %s2774_s28, %s3528_s28   ;;  %s2607_s3 = sphi %s2772_s3, %s3527_s3   ;;  %s2603_s27 = sphi %s2770_s27, %s3526_s27   ;;  %s2599_s26 = sphi %s2768_s26, %s3525_s26   ;;  %s2595_s25 = sphi %s2766_s25, %s3524_s25   ;;  %s2591_s2 = sphi %s2764_s2, %s3523_s2  }
  0x22   : > { %3430 = sst [smem:[#allocation30_spill]] %s2595_s25  ;;  %p1848_p0 = scmp.ge.s32.totalorder %s2631_s5, 1 }
  0x23   : > { %3431 = sst [smem:[#allocation31_spill]] %s2599_s26  ;;  %p3366_p1 = scmp.eq.s32.totalorder %s2820_s22, 0 }
  0x24   : > { %3432 = sst [smem:[#allocation32_spill]] %s2607_s3  ;;  %p572_p2 = scmp.lt.s32.totalorder %s2631_s5, 5 }
  0x25   : > { %3433 = sst [smem:[#allocation33_spill]] %s2611_s28  ;;  %s2633_s1 = smov [#allocation6]  }
  0x26   : > { %3434 = sst [smem:[#allocation34_spill]] %s2615_s29  ;;  %p2825_p3 = pnand %p1848_p0, %p572_p2 }
  0x27   : > { %3435 = sst [smem:[#allocation35_spill]] %s2619_s0  ;;  %s590_s24 = sshll.u32 %s2633_s1, 4  ;;  %s591_s24 = int_to_ptr.vmem [resolvable:$true] %s590_s24 }
  0x28   : > { %3436 = sst [smem:[#allocation36_spill]] %s2627_s30  ;;  %p2016_p4 = pneg %p2825_p3 }
  0x29   : > { %3437 = sst [smem:[#allocation37_spill]] %s2631_s5  ;;  %s3440_s13 = sld [smem:[#allocation48_spill]] }
  0x2a   : > { %s3438_s23 = scalar_select %p2825_p3, 1, 0 }
  0x2b   : > { %p2833_p5 = pnand %p2016_p4, %p3366_p1 }
  0x2d   : > { %s3439_s21 = scalar_select %p2833_p5, 1, 0 }
  0x2e   : > { %p2845_p7 = pneg %p2833_p5 }
  0x2f   : > { %s2203_s12 = scalar_lea.hbm %s3440_s13, 128 }
  0x30   : > { %p2204_p6 = scmp.ne.s32.totalorder %s3440_s13, %s2203_s12  ;;  %p2210_p10 = scmp.lt.u32.totalorder %s2203_s12, %s3440_s13 }
  0x31   : > { %s3441_s1 = scalar_select %p2845_p7, 1, 0 }
  0x32   : > { %p2206_p8 = pnand %p2845_p7, %p2204_p6 }
  0x34   : > { %p2207_p9 = pneg %p2206_p8 }
  0x36   : > { %p2212_p11 = pnand %p2210_p10, %p2207_p9 }
  0x38   : > { %2215 = shalt.err (!%p2212_p11)
}
  0x39   : > { %s2216_s14 = scalar_lea.vmem %s591_s24, 128  ;;  %p2224_p2 = scmp.lt.s32.totalorder %s591_s24, %s591_s24 }
  0x3a   : > { %p2217_p12 = scmp.ne.s32.totalorder %s591_s24, %s2216_s14  ;;  %p2225_p4 = scmp.lt.s32.totalorder %s2216_s14, %s2216_s14 }
  0x3c   : > { %p2219_p13 = pnand %p2217_p12, %p2845_p7  ;;  %p2226_p1 = por %p2225_p4, %p2224_p2 }
  0x3e   : > { %p2220_p0 = pneg %p2219_p13 }
  0x40   : > { %p2227_p3 = pnand %p2226_p1, %p2220_p0 }
  0x42   : > { %2230 = shalt.err (!%p2227_p3)
}
  0x43   : > { %s3369_s10 = smov 64   ;;  %s3371_s6 = smov 4  }
  0x44   : > { %2019 = dma.hbm_to_vmem [thread:$0]  (!%p2833_p5), %s3440_s13, 128, %s591_s24, [#allocation7], %s3369_s10, %s3369_s10, %s3371_s6  }
  0x45   : > { %s1847_s12 = sadd.s32 4294967294, %s2631_s5   ;;  %s47_s19 = sadd.s32 1, %s2623_s4 }
  0x46   : > { %s50_s14 = sadd.s32 1, %s2627_s30  ;;  %p48_p1 = scmp.ge.s32.totalorder %s47_s19, 2 }
  0x47   : > { %s167_s29 = sadd.s32 1, %s2611_s28  ;;  %p174_p3 = scmp.ne.s32.totalorder %s2611_s28, %s2607_s3 }
  0x48   : > { %p175_p6 = scmp.eq.s32.totalorder %s2631_s5, 0  ;;  %s3535_s19 = smov (%p48_p1, %s47_s19), 0 }
  0x49   : > { %3442 = sst [smem:[#allocation38_spill]] %s3535_s19  ;;  %s3537_s14 = smov (!%p48_p1, %s50_s14), %s2627_s30 }
  0x4a   : > { %s164_s24 = ssub.s32 %s2623_s4, %s3535_s19  ;;  %p2876_p8 = por %p175_p6, %p174_p3 }
  0x4b   : > { %p52_p9 = scmp.ge.s32.totalorder %s3537_s14, 2  ;;  %p165_p10 = scmp.eq.s32.totalorder %s164_s24, 0 }
  0x4c   : > { %p180_p11 = scmp.ne.s32.totalorder %s2607_s3, %s2603_s27  ;;  %s548_s11 = sadd.s32 1, %s2599_s26 }
  0x4d   : > { %s3539_s14 = smov (%p52_p9, %s3537_s14), 0  ;;  %p3446_p12 = scmp.eq.s32.totalorder %s2820_s22, 0 }
  0x4e   : > { %3444 = sst [smem:[#allocation39_spill]] %s3539_s14  ;;  %s545_s13 = ssub.s32 %s2627_s30, %s3539_s14 }
  0x4f   : > { %s2886_s10 = scalar_select %p165_p10, %s2611_s28, %s167_s29  }
  0x50   : > { %p2890_p13 = por %p3446_p12, %p180_p11  ;;  %p546_p0 = scmp.eq.s32.totalorder %s545_s13, 0 }
  0x51   : > { %3445 = sst [smem:[#allocation40_spill]] %s2886_s10  ;;  %p558_p2 = scmp.ne.s32.totalorder %s2599_s26, %s2595_s25 }
  0x52   : > { %s3447_s6 = scalar_select %p2890_p13, 1, 0 }
  0x53   : > { %p559_p4 = scmp.eq.s32.totalorder %s2820_s22, 3  ;;  %p564_p1 = scmp.ne.s32.totalorder %s2595_s25, %s2591_s2 }
  0x54   : > { %3448 = sst [smem:[#allocation41_spill]] %s3447_s6  ;;  %p565_p6 = scmp.eq.s32.totalorder %s1847_s12, 3 }
  0x55   : > { %s2902_s27 = scalar_select %p546_p0, %s2599_s26, %s548_s11  }
  0x56   : > { %p2904_p3 = por %p559_p4, %p558_p2  ;;  %p2059_p9 = scmp.lt.s32.totalorder %s2631_s5, 4 }
  0x57   : > { %3449 = sst [smem:[#allocation42_spill]] %s2902_s27  ;;  %s687_s29 = sand.u32 1, %s2631_s5  }
  0x58   : > { %s3450_s24 = scalar_select %p2904_p3, 1, 0 }
  0x59   : > { %p2910_p10 = por %p565_p6, %p564_p1  ;;  %s2915_s10 = sand.u32 1, %s2611_s28  }
  0x5a   : > { %3451 = sst [smem:[#allocation43_spill]] %s3450_s24  ;;  %s1858_s13 = sshll.u32 %s2623_s4, 5 }
  0x5b   : > { %s3452_s19 = scalar_select %p2910_p10, 1, 0 }
  0x5c   : > { %s1857_s14 = sshll.u32 %s2915_s10, 1  ;;  %s3454_s11 = sld [smem:[#allocation50_spill]] }
  0x5d   : > { %3453 = sst [smem:[#allocation44_spill]] %s3452_s19  ;;  %p2926_p11 = pnand %p2059_p9, %p2876_p8 }
  0x5e   : > { %s691_s28 = scalar_lea.vmem [#allocation11], %s1857_s14  ;;  %s2932_s19 = scalar_lea.sflag [#allocation7], %s687_s29 }
  0x5f   : > { %s3455_s12 = scalar_select %p2926_p11, 1, 0 }
  0x60   : > { %s698_s26 = sshll.u32 %s691_s28, 4  ;;  %p2938_p0 = pneg %p2926_p11  ;;  %s2930_s26 = int_to_ptr.vmem [resolvable:$true] %s698_s26 }
  0x62   : > { %s2922_s27 = scalar_lea.hbm %s3454_s11, %s1858_s13  ;;  %s2236_s14 = scalar_lea.hbm %s3454_s11, 64 }
  0x63   : > { %s2231_s5 = scalar_lea.hbm %s2922_s27, 32  ;;  %p2237_p4 = scmp.lt.u32.totalorder %s2922_s27, %s3454_s11 }
  0x64   : > { %p2232_p12 = scmp.ne.s32.totalorder %s2922_s27, %s2231_s5  ;;  %p2238_p1 = scmp.lt.u32.totalorder %s2236_s14, %s2231_s5 }
  0x65   : > { %s3456_s2 = scalar_select %p2938_p0, 1, 0 }
  0x66   : > { %p2234_p8 = pnand %p2938_p0, %p2232_p12  ;;  %p2239_p6 = por %p2238_p1, %p2237_p4 }
  0x67   : > { %p2240_p9 = scmp.lt.u32.totalorder %s2231_s5, %s2922_s27 }
  0x68   : > { %p2235_p2 = pneg %p2234_p8 }
  0x69   : > { %p2241_p10 = por %p2240_p9, %p2239_p6 }
  0x6b   : > { %p2242_p3 = pnand %p2241_p10, %p2235_p2 }
  0x6d   : > { %2245 = shalt.err (!%p2242_p3)
}
  0x6e   : > { %s2246_s29 = scalar_lea.vmem %s2930_s26, 32  ;;  %s2636_s30 = smov [#allocation11]  }
  0x6f   : > { %p2247_p12 = scmp.ne.s32.totalorder %s2930_s26, %s2246_s29  ;;  %s2251_s8 = sshll.u32 %s2636_s30, 4  ;;  %s2252_s8 = int_to_ptr.vmem [resolvable:$false] %s2251_s8 }
  0x70   : > { %s2253_s28 = scalar_lea.vmem %s2252_s8, 64  ;;  %p2254_p5 = scmp.lt.s32.totalorder %s2930_s26, %s2252_s8 }
  0x71   : > { %p2249_p8 = pnand %p2247_p12, %p2938_p0  ;;  %p2255_p7 = scmp.lt.s32.totalorder %s2253_s28, %s2246_s29 }
  0x73   : > { %p2250_p13 = pneg %p2249_p8  ;;  %p2256_p4 = por %p2255_p7, %p2254_p5 }
  0x75   : > { %p2257_p1 = pnand %p2256_p4, %p2250_p13 }
  0x77   : > { %2260 = shalt.err (!%p2257_p1)
}
  0x78   : > { %2041 = dma.hbm_to_vmem [thread:$0]  (!%p2926_p11), %s2922_s27, 32, %s2930_s26, %s2932_s19  }
  0x79   : > { %s2637_s5 = smov [#allocation9]   ;;  %s2638_s13 = smov [#allocation15]  }
  0x7a   : > { %s604_s14 = sshll.u32 %s2637_s5, 4  ;;  %s628_s11 = sshll.u32 %s2638_s13, 4  ;;  %s605_s14 = int_to_ptr.vmem [resolvable:$true] %s604_s14  ;;  %s629_s11 = int_to_ptr.vmem [resolvable:$true] %s628_s11 }
  0x7b   : > { %s3457_s0 = sld [smem:[#allocation49_spill]]  ;;  %p3459_p7 = scmp.ne.s32.totalorder %s3441_s1, 0 }
  0x81   : > { %s3458_s6 = smov %s3457_s0  ;;  %s2261_s8 = scalar_lea.hbm %s3457_s0, 16 }
  0x82   : > { %p2262_p5 = scmp.ne.s32.totalorder %s3458_s6, %s2261_s8  ;;  %p2268_p10 = scmp.lt.u32.totalorder %s2261_s8, %s3458_s6 }
  0x84   : > { %p2264_p13 = pnand %p2262_p5, %p3459_p7 }
  0x86   : > { %p2265_p3 = pneg %p2264_p13 }
  0x88   : > { %p2270_p2 = pnand %p2268_p10, %p2265_p3 }
  0x8a   : > { %2273 = shalt.err (!%p2270_p2)
}
  0x8b   : > { %s2274_s26 = scalar_lea.vmem %s605_s14, 16  ;;  %s2281_s0 = scalar_lea.vmem %s605_s14, 32 }
  0x8c   : > { %p2275_p6 = scmp.ne.s32.totalorder %s605_s14, %s2274_s26  ;;  %p2282_p8 = scmp.lt.s32.totalorder %s605_s14, %s605_s14 }
  0x8d   : > { %p2283_p4 = scmp.lt.s32.totalorder %s2281_s0, %s2274_s26 }
  0x8e   : > { %p2277_p9 = pnand %p2275_p6, %p3459_p7 }
  0x8f   : > { %p2284_p1 = por %p2283_p4, %p2282_p8 }
  0x90   : > { %p2278_p12 = pneg %p2277_p9 }
  0x92   : > { %p2285_p11 = pnand %p2284_p1, %p2278_p12 }
  0x94   : > { %2288 = shalt.err (!%p2285_p11)
}
  0x95   : > { %p3460_p5 = scmp.ne.s32.totalorder %s3439_s21, 0  ;;  %s3461_s16 = sld [smem:[#allocation61_spill]] }
  0x97   : > { %2022 = dma.hbm_to_vmem [thread:$0]  (!%p3460_p5), %s3458_s6, 16, %s605_s14, [#allocation10]  }
  0x9b   : > { %s2289_s5 = scalar_lea.hbm %s3461_s16, 256 }
  0x9c   : > { %p2290_p13 = scmp.ne.s32.totalorder %s3461_s16, %s2289_s5  ;;  %p2296_p11 = scmp.lt.u32.totalorder %s2289_s5, %s3461_s16 }
  0x9e   : > { %p2292_p3 = pnand %p2290_p13, %p3459_p7 }
  0xa0   : > { %p2293_p10 = pneg %p2292_p3 }
  0xa2   : > { %p2298_p2 = pnand %p2296_p11, %p2293_p10 }
  0xa4   : > { %2301 = shalt.err (!%p2298_p2)
}
  0xa5   : > { %s2302_s28 = scalar_lea.vmem %s629_s11, 256  ;;  %p2310_p8 = scmp.lt.s32.totalorder %s629_s11, %s629_s11 }
  0xa6   : > { %p2303_p6 = scmp.ne.s32.totalorder %s629_s11, %s2302_s28  ;;  %p2311_p4 = scmp.lt.s32.totalorder %s2302_s28, %s2302_s28 }
  0xa8   : > { %p2305_p9 = pnand %p2303_p6, %p3459_p7  ;;  %p2312_p1 = por %p2311_p4, %p2310_p8 }
  0xaa   : > { %p2306_p12 = pneg %p2305_p9 }
  0xac   : > { %p2313_p0 = pnand %p2312_p1, %p2306_p12 }
  0xae   : > { %2316 = shalt.err (!%p2313_p0)
}
  0xaf   : > { %s3462_s14 = smov 4   ;;  %s3463_s26 = smov 64  }
  0xb0   : > { %2028 = dma.hbm_to_vmem [thread:$0]  (!%p3460_p5), %s3461_s16, 256, %s629_s11, [#allocation16], %s3463_s26, %s3463_s26, %s3462_s14  }
  0xb1   : > { %s2639_s24 = smov [#allocation18]   ;;  %s3404_s3 = sshll.u32 %s2623_s4, 4 }
  0xb2   : > { %s655_s25 = sshll.u32 %s2639_s24, 4  ;;  %s3464_s18 = sld [smem:[#allocation63_spill]]  ;;  %s656_s25 = int_to_ptr.vmem [resolvable:$true] %s655_s25 }
  0xb8   : > { %s2317_s30 = scalar_lea.hbm %s3464_s18, 16 }
  0xb9   : > { %p2318_p0 = scmp.ne.s32.totalorder %s3464_s18, %s2317_s30  ;;  %p2324_p10 = scmp.lt.u32.totalorder %s2317_s30, %s3464_s18 }
  0xbb   : > { %p2320_p13 = pnand %p2318_p0, %p3459_p7 }
  0xbd   : > { %p2321_p3 = pneg %p2320_p13 }
  0xbf   : > { %p2326_p11 = pnand %p2324_p10, %p2321_p3 }
  0xc1   : > { %2329 = shalt.err (!%p2326_p11)
}
  0xc2   : > { %s2330_s11 = scalar_lea.vmem %s656_s25, 16  ;;  %s2337_s27 = scalar_lea.vmem %s656_s25, 32 }
  0xc3   : > { %p2331_p2 = scmp.ne.s32.totalorder %s656_s25, %s2330_s11  ;;  %p2338_p12 = scmp.lt.s32.totalorder %s656_s25, %s656_s25 }
  0xc4   : > { %p2339_p8 = scmp.lt.s32.totalorder %s2337_s27, %s2330_s11 }
  0xc5   : > { %p2333_p6 = pnand %p2331_p2, %p3459_p7 }
  0xc6   : > { %p2340_p4 = por %p2339_p8, %p2338_p12 }
  0xc7   : > { %p2334_p9 = pneg %p2333_p6 }
  0xc9   : > { %p2341_p1 = pnand %p2340_p4, %p2334_p9 }
  0xcb   : > { %2344 = shalt.err (!%p2341_p1)
}
  0xcc   : > { %2034 = dma.hbm_to_vmem [thread:$0]  (!%p3460_p5), %s3464_s18, 16, %s656_s25, [#allocation19]  }
  0xcd   : > { %s3465_s7 = sld [smem:[#allocation52_spill]]  ;;  %s716_s29 = scalar_lea.vmem [#allocation12], %s2915_s10 }
  0xce   : > { %s723_s28 = sshll.u32 %s716_s29, 4  ;;  %p3466_p13 = scmp.ne.s32.totalorder %s3456_s2, 0  ;;  %s724_s28 = int_to_ptr.vmem [resolvable:$true] %s723_s28 }
  0xd3   : > { %s3025_s8 = scalar_lea.hbm %s3465_s7, %s3404_s3  ;;  %s2350_s27 = scalar_lea.hbm %s3465_s7, 32 }
  0xd4   : > { %s2345_s0 = scalar_lea.hbm %s3025_s8, 16  ;;  %p2351_p11 = scmp.lt.u32.totalorder %s3025_s8, %s3465_s7 }
  0xd5   : > { %p2346_p0 = scmp.ne.s32.totalorder %s3025_s8, %s2345_s0  ;;  %p2352_p2 = scmp.lt.u32.totalorder %s2350_s27, %s2345_s0 }
  0xd6   : > { %p2354_p9 = scmp.lt.u32.totalorder %s2345_s0, %s3025_s8 }
  0xd7   : > { %p2348_p3 = pnand %p2346_p0, %p3466_p13  ;;  %p2353_p6 = por %p2352_p2, %p2351_p11 }
  0xd9   : > { %p2349_p10 = pneg %p2348_p3  ;;  %p2355_p12 = por %p2354_p9, %p2353_p6 }
  0xdb   : > { %p2356_p8 = pnand %p2355_p12, %p2349_p10 }
  0xdd   : > { %2359 = shalt.err (!%p2356_p8)
}
  0xde   : > { %s2360_s13 = scalar_lea.vmem %s724_s28, 16  ;;  %s2640_s30 = smov [#allocation12]  }
  0xdf   : > { %p2361_p4 = scmp.ne.s32.totalorder %s724_s28, %s2360_s13  ;;  %s2365_s29 = sshll.u32 %s2640_s30, 4  ;;  %s2366_s29 = int_to_ptr.vmem [resolvable:$false] %s2365_s29 }
  0xe0   : > { %s2367_s11 = scalar_lea.vmem %s2366_s29, 32  ;;  %p2368_p3 = scmp.lt.s32.totalorder %s724_s28, %s2366_s29 }
  0xe1   : > { %p2363_p1 = pnand %p2361_p4, %p3466_p13  ;;  %p2369_p5 = scmp.lt.s32.totalorder %s2367_s11, %s2360_s13 }
  0xe3   : > { %p2364_p0 = pneg %p2363_p1  ;;  %p2370_p7 = por %p2369_p5, %p2368_p3 }
  0xe5   : > { %p2371_p2 = pnand %p2370_p7, %p2364_p0 }
  0xe7   : > { %2374 = shalt.err (!%p2371_p2)
}
  0xe8   : > { %p3467_p11 = scmp.ne.s32.totalorder %s3455_s12, 0  ;;  %s2641_s0 = smov [#allocation14]  }
  0xe9   : > { %s618_s25 = sshll.u32 %s2641_s0, 4  ;;  %s2642_s27 = smov [#allocation17]   ;;  %s619_s25 = int_to_ptr.vmem [resolvable:$true] %s618_s25 }
  0xea   : > { %2044 = dma.hbm_to_vmem [thread:$0]  (!%p3467_p11), %s3025_s8, 16, %s724_s28, %s2932_s19  }
  0xeb   : > { %s641_s24 = sshll.u32 %s2642_s27, 4  ;;  %s3468_s15 = sld [smem:[#allocation60_spill]]  ;;  %s642_s24 = int_to_ptr.vmem [resolvable:$true] %s641_s24 }
  0xec   : > { %p3469_p5 = scmp.ne.s32.totalorder %s3441_s1, 0 }
  0xf1   : > { %s2375_s3 = scalar_lea.hbm %s3468_s15, 16 }
  0xf2   : > { %p2376_p7 = scmp.ne.s32.totalorder %s3468_s15, %s2375_s3  ;;  %p2382_p9 = scmp.lt.u32.totalorder %s2375_s3, %s3468_s15 }
  0xf4   : > { %p2378_p10 = pnand %p2376_p7, %p3469_p5 }
  0xf6   : > { %p2379_p6 = pneg %p2378_p10 }
  0xf8   : > { %p2384_p12 = pnand %p2382_p9, %p2379_p6 }
  0xfa   : > { %2387 = shalt.err (!%p2384_p12)
}
  0xfb   : > { %s2388_s8 = scalar_lea.vmem %s619_s25, 16  ;;  %s2395_s28 = scalar_lea.vmem %s619_s25, 32 }
  0xfc   : > { %p2389_p8 = scmp.ne.s32.totalorder %s619_s25, %s2388_s8  ;;  %p2396_p0 = scmp.lt.s32.totalorder %s619_s25, %s619_s25 }
  0xfd   : > { %p2397_p3 = scmp.lt.s32.totalorder %s2395_s28, %s2388_s8 }
  0xfe   : > { %p2391_p4 = pnand %p2389_p8, %p3469_p5 }
  0xff   : > { %p2398_p2 = por %p2397_p3, %p2396_p0 }
 0x100   : > { %p2392_p1 = pneg %p2391_p4 }
 0x102   : > { %p2399_p11 = pnand %p2398_p2, %p2392_p1 }
 0x104   : > { %2402 = shalt.err (!%p2399_p11)
}
 0x105   : > { %p3470_p7 = scmp.ne.s32.totalorder %s3439_s21, 0  ;;  %s3471_s17 = sld [smem:[#allocation62_spill]] }
 0x107   : > { %2025 = dma.hbm_to_vmem [thread:$0]  (!%p3470_p7), %s3468_s15, 16, %s619_s25, [#allocation10]  }
 0x10b   : > { %s2403_s5 = scalar_lea.hbm %s3471_s17, 128 }
 0x10c   : > { %p2404_p10 = scmp.ne.s32.totalorder %s3471_s17, %s2403_s5  ;;  %p2410_p11 = scmp.lt.u32.totalorder %s2403_s5, %s3471_s17 }
 0x10e   : > { %p2406_p6 = pnand %p2404_p10, %p3469_p5 }
 0x110   : > { %p2407_p9 = pneg %p2406_p6 }
 0x112   : > { %p2412_p12 = pnand %p2410_p11, %p2407_p9 }
 0x114   : > { %2415 = shalt.err (!%p2412_p12)
}
 0x115   : > { %s2416_s8 = scalar_lea.vmem %s642_s24, 128  ;;  %p2424_p0 = scmp.lt.s32.totalorder %s642_s24, %s642_s24 }
 0x116   : > { %p2417_p8 = scmp.ne.s32.totalorder %s642_s24, %s2416_s8  ;;  %p2425_p3 = scmp.lt.s32.totalorder %s2416_s8, %s2416_s8 }
 0x118   : > { %p2419_p4 = pnand %p2417_p8, %p3469_p5  ;;  %p2426_p2 = por %p2425_p3, %p2424_p0 }
 0x11a   : > { %p2420_p1 = pneg %p2419_p4 }
 0x11c   : > { %p2427_p13 = pnand %p2426_p2, %p2420_p1 }
 0x11e   : > { %2430 = shalt.err (!%p2427_p13)
}
 0x11f   : > { %2031 = dma.hbm_to_vmem [thread:$0]  (!%p3470_p7), %s3471_s17, 128, %s642_s24, [#allocation16], %s3463_s26, %s3463_s26, %s3462_s14  }
 0x120   : > { %s2643_s0 = smov [#allocation20]   ;;  %s3472_s6 = sshll.u32 %s2623_s4, 4 }
 0x121   : > { %s669_s27 = sshll.u32 %s2643_s0, 4  ;;  %s3473_s9 = sld [smem:[#allocation54_spill]]  ;;  %s670_s27 = int_to_ptr.vmem [resolvable:$true] %s669_s27 }
 0x122   : > { %s2431_s11 = scalar_lea.hbm %s3359_s20, 16 }
 0x123   : > { %p2432_p13 = scmp.ne.s32.totalorder %s3359_s20, %s2431_s11  ;;  %p2438_p9 = scmp.lt.u32.totalorder %s2431_s11, %s3359_s20 }
 0x125   : > { %p2434_p10 = pnand %p2432_p13, %p3469_p5 }
 0x127   : > { %s3090_s30 = scalar_lea.hbm %s3473_s9, %s3472_s6  ;;  %p2435_p6 = pneg %p2434_p10 }
 0x129   : > { %p2440_p11 = pnand %p2438_p9, %p2435_p6 }
 0x12b   : > { %2443 = shalt.err (!%p2440_p11)
}
 0x12c   : > { %s2444_s24 = scalar_lea.vmem %s670_s27, 16  ;;  %s2451_s25 = scalar_lea.vmem %s670_s27, 32 }
 0x12d   : > { %p2445_p12 = scmp.ne.s32.totalorder %s670_s27, %s2444_s24  ;;  %p2452_p1 = scmp.lt.s32.totalorder %s670_s27, %s670_s27 }
 0x12e   : > { %p2453_p0 = scmp.lt.s32.totalorder %s2451_s25, %s2444_s24 }
 0x12f   : > { %p2447_p8 = pnand %p2445_p12, %p3469_p5 }
 0x130   : > { %p2454_p3 = por %p2453_p0, %p2452_p1 }
 0x131   : > { %p2448_p4 = pneg %p2447_p8 }
 0x133   : > { %p2455_p2 = pnand %p2454_p3, %p2448_p4 }
 0x135   : > { %2458 = shalt.err (!%p2455_p2)
}
 0x136   : > { %2037 = dma.hbm_to_vmem [thread:$0]  (!%p3470_p7), %s3359_s20, 16, %s670_s27, [#allocation19]  }
 0x137   : > { %s741_s1 = scalar_lea.vmem [#allocation13], %s2915_s10  ;;  %s2459_s6 = scalar_lea.hbm %s3090_s30, 16 }
 0x138   : > { %s748_s0 = sshll.u32 %s741_s1, 4  ;;  %p2460_p5 = scmp.ne.s32.totalorder %s3090_s30, %s2459_s6  ;;  %s749_s0 = int_to_ptr.vmem [resolvable:$true] %s748_s0 }
 0x139   : > { %p3474_p13 = scmp.ne.s32.totalorder %s3456_s2, 0  ;;  %s2464_s5 = scalar_lea.hbm %s3473_s9, 32 }
 0x13a   : > { %p2465_p9 = scmp.lt.u32.totalorder %s3090_s30, %s3473_s9  ;;  %p2466_p11 = scmp.lt.u32.totalorder %s2464_s5, %s2459_s6 }
 0x13b   : > { %p2462_p10 = pnand %p2460_p5, %p3474_p13  ;;  %p2468_p8 = scmp.lt.u32.totalorder %s2459_s6, %s3090_s30 }
 0x13c   : > { %p2467_p12 = por %p2466_p11, %p2465_p9 }
 0x13d   : > { %p2463_p6 = pneg %p2462_p10 }
 0x13e   : > { %p2469_p7 = por %p2468_p8, %p2467_p12 }
 0x140   : > { %p2470_p4 = pnand %p2469_p7, %p2463_p6 }
 0x142   : > { %2473 = shalt.err (!%p2470_p4)
}
 0x143   : > { %s2474_s10 = scalar_lea.vmem %s749_s0, 16  ;;  %s2644_s27 = smov [#allocation13]  }
 0x144   : > { %p2475_p1 = scmp.ne.s32.totalorder %s749_s0, %s2474_s10  ;;  %s2479_s11 = sshll.u32 %s2644_s27, 4  ;;  %s2480_s11 = int_to_ptr.vmem [resolvable:$false] %s2479_s11 }
 0x145   : > { %s2481_s8 = scalar_lea.vmem %s2480_s11, 32  ;;  %p2482_p2 = scmp.lt.s32.totalorder %s749_s0, %s2480_s11 }
 0x146   : > { %p2477_p0 = pnand %p2475_p1, %p3474_p13  ;;  %p2483_p5 = scmp.lt.s32.totalorder %s2481_s8, %s2474_s10 }
 0x148   : > { %p2478_p3 = pneg %p2477_p0  ;;  %p2484_p10 = por %p2483_p5, %p2482_p2 }
 0x14a   : > { %p2485_p9 = pnand %p2484_p10, %p2478_p3 }
 0x14c   : > { %2488 = shalt.err (!%p2485_p9)
}
 0x14d   : > { %p3475_p11 = scmp.ne.s32.totalorder %s3455_s12, 0  ;;  %p3476_p6 = scmp.ne.s32.totalorder %s3438_s23, 0 }
 0x14e   : > { %p3477_p13 = scmp.eq.s32.totalorder (!%p3476_p6), %s2820_s22, 0 }
 0x14f   : > { %2047 = dma.hbm_to_vmem [thread:$0]  (!%p3475_p11), %s3090_s30, 16, %s749_s0, %s2932_s19  }
 0x150   : > { %781 = sbr.rel (%p3476_p6) target bundleno = 3052 (0xbec), region = 104 }
 0x157   : > { %2562 = dma.done.wait (%p3477_p13), [#allocation7], 128   ;;  %p3478_p12 = pmov %p3477_p13 }
 0x159   : > { %2564 = vsyncadd (%p3478_p12), [#allocation7], 4294967168  ;;  %p3479_p8 = pmov %p3478_p12 }
 0x15b   : > { %2566 = dma.done.wait (%p3479_p8), [#allocation10], 16   ;;  %p3480_p7 = pmov %p3479_p8 }
 0x15c   : > { %s3481_s12 = sld [smem:[#allocation32_spill]]  ;;  %s3482_s2 = sld [smem:[#allocation41_spill]] }
 0x15d   : > { %2568 = vsyncadd (%p3480_p7), [#allocation10], 4294967280  ;;  %s791_s14 = sand.u32 1, %s2820_s22  }
 0x15e   : > { %s792_s30 = scalar_lea.sflag [#allocation7], %s791_s14 }
 0x162   : > { %s3141_s19 = sand.u32 1, %s3481_s12   ;;  %p3483_p4 = scmp.ne.s32.totalorder %s3482_s2, 0 }
 0x163   : > { %s1864_s23 = sshll.u32 %s3141_s19, 1 }
 0x164   : > { %s3144_s26 = scalar_lea.vmem [#allocation11], %s1864_s23 }
 0x165   : > { %2570 = dma.done.wait (%p3483_p4), %s792_s30, 64  }
 0x166   : > { %2572 = vsyncadd (%p3483_p4), %s792_s30, 4294967232  ;;  %p3484_p1 = pmov %p3480_p7 }
 0x168   : > { %2574 = dma.done.wait (%p3484_p1), [#allocation10], 16   ;;  %p3485_p0 = pmov %p3484_p1 }
 0x16a   : > { %2576 = vsyncadd (%p3485_p0), [#allocation10], 4294967280  ;;  %p3486_p3 = pmov %p3485_p0 }
 0x16b   : > { %p3487_p2 = pmov %p3485_p0 }
 0x16c   : > { %2578 = dma.done.wait (%p3486_p3), [#allocation16], 384  }
 0x16d   : > { %2580 = vsyncadd (%p3487_p2), [#allocation16], 4294966912  ;;  %p3488_p5 = pmov %p3485_p0 }
 0x16e   : > { %p3489_p10 = pmov %p3485_p0 }
 0x16f   : > { %2582 = dma.done.wait (%p3488_p5), [#allocation19], 32  }
 0x170   : > { %2584 = vsyncadd (%p3489_p10), [#allocation19], 4294967264  ;;  %s3490_s7 = sld [smem:[#allocation30_spill]]  ;;  %s3491_s28 = sld [smem:[#allocation35_spill]] }
 0x171   : > { %s3492_s1 = sld [smem:[#allocation34_spill]]  ;;  %s3493_s29 = sld [smem:[#allocation45_spill]] }
 0x172   : > { %s3494_s8 = sld [smem:[#allocation51_spill]]  ;;  %s3495_s23 = sld [smem:[#allocation53_spill]] }
 0x173   : > { %s3496_s25 = sld [smem:[#allocation55_spill]]  ;;  %s3497_s15 = sld [smem:[#allocation56_spill]] }
 0x176   : > { %s3407_s0 = sand.u32 1, %s3490_s7   ;;  %p924_p9 = scmp.lt.s32.totalorder %s3491_s28, 1 }
 0x177   : > { %s3168_s6 = sshll.u32 %s3407_s0, 2  ;;  %p928_p11 = scmp.lt.s32.totalorder %s3492_s1, 1 }
 0x178   : > { %s3541_s28 = smov (!%p924_p9, %s3491_s28), 1  ;;  %s923_s18 = scalar_lea.vmem [#allocation21], %s3168_s6 }
 0x179   : > { %s3173_s3 = scalar_select %p928_p11, %s3492_s1, 1 }
 0x17a   : > { %s1871_s22 = sshll.u32 %s3541_s28, 2  ;;  %p1876_p6 = scmp.ne.s32.totalorder %s3492_s1, 0 }
 0x17b   : > { %s927_s13 = scalar_lea.vmem %s3493_s29, %s1871_s22  ;;  %s1910_s10 = sshll.u32 %s3173_s3, 4  ;;  %vm956_vm0 = vcmask (!%p1876_p6), 125952   ;;  %v2645_v3 = vmov (!%p1876_p6), 0   ;;  %vm992_vm1 = vcmask (!%p1876_p6), 3072   ;;  %v2175_v10 = vld [vmem:[#allocation6] sm:$0xff] (!%p1876_p6)   ;;  %v2646_v11 = vmov (!%p1876_p6), 0.0  }
 0x17c   : > { %s3182_s12 = scalar_lea.vmem %s3494_s8, %s1910_s10  ;;  %s3187_s30 = scalar_lea.vmem %s3495_s23, %s1910_s10  ;;  %v955_v0 = vld [vmem:[%s927_s13] sm:$0xf] (!%p1876_p6)  ;;  %2173 = vset.pattern.permute.xlu1 (!%p1876_p6), %v2645_v3  ;;  %2174 = vset.pattern.permute.xlu0 (!%p1876_p6), %v2645_v3  ;;  %vm2647_vm2 = vmmov (!%p1876_p6), 0   ;;  %vm996_vm5 = vcmask (!%p1876_p6), 123904   ;;  %vm1013_vm6 = vcmask (!%p1876_p6), 130048   ;;  %vm1057_vm7 = vcmask (!%p1876_p6), 257024  }
 0x17d   : > { %s940_s24 = scalar_lea.vmem %s3496_s25, %s3173_s3  ;;  %s943_s21 = scalar_lea.vmem %s3497_s15, %s3173_s3  ;;  %v957_v1 = vsel (!%p1876_p6), %vm956_vm0, %v955_v0, 0.0  ;;  %1930 = vmatprep.subr.bf16.mxu0 (!%p1876_p6), %v2646_v11  ;;  %1932 = vmatprep.mubr.msk.bf16.mxu0 (!%p1876_p6), %vm2647_vm2, %v2646_v11  ;;  %v1877_v27 = vld [vmem:[#allocation9] ss:$0 sm:$0xff] (!%p1876_p6) }
 0x17e   : > { %s3498_s29 = sld [smem:[#allocation57_spill]]  ;;  %s3499_s8 = sld [smem:[#allocation58_spill]]  ;;  %958 = vadd.xlane.f32.xlu0 (!%p1876_p6), %v957_v1  ;;  %1931 = vmatpush3.bf16.msra.mxu0 (!%p1876_p6), %v2175_v10 }
 0x17f   : > { %954 = sbr.rel (%p1876_p6) target bundleno = 926 (0x39e), region = 148  ;;  %s3500_s15 = sld [smem:[#allocation46_spill]] (!%p1876_p6) }
 0x180   : > { %s3501_s2 = sld [smem:[#allocation47_spill]] (!%p1876_p6) }
 0x184   : > { %s946_s16 = scalar_lea.vmem %s3498_s29, %s3173_s3  ;;  %s949_s17 = scalar_lea.vmem %s3499_s8, %s3173_s3 }
 0x185   : > { %v978_v2 = vld [vmem:[%s3500_s15] sm:$0xf] (!%p1876_p6) }
 0x186   : > { %981 = vperm.xlu1 %2173, %v978_v2   ;;  %v985_v4 = vld [vmem:[%s3501_s2] sm:$0xf] }
 0x18a   : > { %988 = vperm.xlu1 %2173, %v985_v4  }
 0x205   : > { %v982_v20 = vpop.permute.xlu1 %981 }
 0x209   : > { %v989_v24 = vpop.permute.xlu1 %988 }
 0x20b   : > { %v959_v5 = vpop.xlane.xlu0 %958 }
 0x20c   : > { %v961_v6 = vmul.f32 0.0625, %v959_v5 }
 0x20e   : > { %v962_v7 = vsub.f32 %v955_v0, %v961_v6  ;;  %993 = vst.msk [vmem:[#allocation4] sm:$0xf] %vm992_vm1, %v961_v6 }
 0x210   : > { %v963_v8 = vmul.f32 %v962_v7, %v962_v7 }
 0x212   : > { %v964_v9 = vsel %vm956_vm0, %v963_v8, 0.0 }
 0x213   : > { %965 = vadd.xlane.f32.xlu0 %v964_v9 }
 0x2a0   : > { %v966_v12 = vpop.xlane.xlu0 %965 }
 0x2a1   : > { %v967_v13 = vmul.f32 0.0625, %v966_v12 }
 0x2a3   : > { %v968_v14 = vadd.f32 1e-05, %v967_v13 }
 0x2a5   : > { %2176 = vrsqrt.f32 %v968_v14  ;;  %vm971_vm3 = vcmp.eq.f32.partialorder %v968_v14, inf  ;;  %v974_v17 = vand.u32 2147483648, %v968_v14  ;;  %vm973_vm4 = vcmp.eq.f32.partialorder %v968_v14, 0.0 }
 0x2af   : > { %v2177_v15 = vpop.eup %2176 }
 0x2b0   : > { %v970_v16 = vmul.f32 %v2177_v15, %v968_v14 }
 0x2b2   : > { %v972_v18 = vsel %vm971_vm3, %v968_v14, %v970_v16 }
 0x2b3   : > { %v975_v19 = vsel %vm973_vm4, %v974_v17, %v972_v18 }
 0x2b4   : > { %2178 = vrcp.f32 %v975_v19  ;;  %994 = vst.msk [vmem:[#allocation5] sm:$0xf] %vm992_vm1, %v975_v19 }
 0x2be   : > { %v2179_v21 = vpop.eup %2178 }
 0x2bf   : > { %v977_v22 = vmul.f32 %v2179_v21, %v962_v7 }
 0x2c1   : > { %v984_v23 = vmul.f32 %v982_v20, %v977_v22 }
 0x2c3   : > { %v991_v25 = vadd.f32 %v989_v24, %v984_v23 }
 0x2c5   : > { %v995_v26 = vpack.c.bf16 %v991_v25, %v991_v25 }
 0x2c7   : > { %997 = vst.msk [vmem:[#allocation3] sm:$0x3] %vm996_vm5, %v995_v26  ;;  %1933 = vmatmul.mubr.msk.bf16.vlgmr.msra.gmra.mrb[0].mxu0 %vm1013_vm6, %v995_v26 }
 0x39a   : > { %v1051_v28 = vpop.f32.mrb[0].mxu0 }
 0x39b   : > { %v1052_v29 = vadd.f32 %v1877_v27, %v1051_v28  ;;  %v1934_v30 = vpop.f32.mrb[1].mxu0 }
 0x39c   : > { %v1054_v31 = vpop.f32.mrb[2].mxu0 }
 0x39d   : > { %1058 = vst.msk [vmem:[#allocation2] sm:$0xf] %vm1057_vm7, %v1052_v29  ;;  %v1935_v32 = vpop.f32.mrb[3].mxu0 }
 0x39e PF: > { %vm1066_vm8 = vcmask 1041408   ;;  %v2648_v34 = vmov 0.0   ;;  %vm2649_vm9 = vmmov 0   ;;  %v1060_v37 = vld [vmem:[%s3144_s26] sm:$0x3]  ;;  %vm1062_vm10 = vcmask 31744  }
 0x39f   : > { %1936 = vmatprep.subr.bf16.mxu0 %v2648_v34  ;;  %1938 = vmatprep.mubr.msk.bf16.mxu0 %vm2649_vm9, %v2648_v34  ;;  %vm1111_vm11 = vcmask 257024   ;;  %v2180_v49 = vld [vmem:[%s3182_s12] sm:$0xff]   ;;  %v2181_v50 = vld [vmem:[%s3182_s12 + $0x8] sm:$0xff]   ;;  %vm1166_vm12 = vcmask 261120   ;;  %s3504_s12 = scalar_lea.vmem [#allocation12], %s3141_s19  ;;  %s3508_s29 = sld [smem:[#allocation34_spill]] }
 0x3a0   : > { %1942 = vmatprep.subr.bf16.mxu1 %v2648_v34  ;;  %1946 = vmatprep.mubr.msk.bf16.mxu1 %vm2649_vm9, %v2648_v34  ;;  %v1881_v55 = vld [vmem:[%s940_s24] ss:$0 sm:$0xff]  ;;  %v2183_v62 = vld [vmem:[%s3187_s30 + $0x8] sm:$0xff]   ;;  %s3505_s24 = scalar_lea.vmem [#allocation13], %s3141_s19 }
 0x3a1   : > { %1943 = vmatpush3.bf16.msra.mxu1 %v2180_v49  ;;  %v1882_v57 = vld [vmem:[%s943_s21] ss:$0 sm:$0xff] }
 0x3a2   : > { %1944 = vmatprep.subr.bf16.mxu1 %v2648_v34  ;;  %v2182_v61 = vld [vmem:[%s3187_s30] sm:$0xff]  }
 0x3a3   : > { %v1883_v63 = vld [vmem:[%s3504_s12] ss:$0 sm:$0xff] }
 0x3a4   : > { %v1059_v33 = vld [vmem:[#allocation2] sm:$0xf] }
 0x3a5   : > { %v1061_v35 = vpack.c.bf16 %v1059_v33, %v1059_v33  ;;  %1945 = vmatpush3.bf16.msra.mxu1 %v2181_v50  ;;  %v1887_v15 = vld [vmem:[%s3505_s24] ss:$0 sm:$0xff]  ;;  %p1893_p13 = scmp.ne.s32.totalorder %s3508_s29, 1 }
 0x3a6   : > { %v1891_v32 = vld [vmem:[%s946_s16] ss:$0 sm:$0xff]  ;;  %vm1364_vm13 = vcmask (!%p1893_p13), 130048   ;;  %vm2651_vm14 = vmmov (!%p1893_p13), 0   ;;  %s3509_s3 = sld [smem:[#allocation59_spill]] (!%p1893_p13)  ;;  %s3510_s8 = sld [smem:[#allocation64_spill]] (!%p1893_p13) }
 0x3a7   : > { %v1068_v36 = vsel %vm1066_vm8, %v1061_v35, 0  ;;  %s3511_s10 = sld [smem:[#allocation46_spill]] (!%p1893_p13)  ;;  %s3512_s1 = sld [smem:[#allocation47_spill]] (!%p1893_p13)  ;;  %vm1577_vm15 = vcmask (!%p1893_p13), 60416  }
 0x3a8   : > { %1937 = vmatpush3.bf16.msra.mxu0 %v1068_v36 }
 0x3a9   : > { %1950 = vmatprep.subr.bf16.mxu0 %v2648_v34 }
 0x3ab   : > { %1939 = vmatmul.mubr.msk.bf16.vlgmr.msra.gmra.mrb[0].mxu0 %vm1062_vm10, %v1060_v37 }
 0x3ac   : > { %1954 = vmatprep.mubr.msk.bf16.mxu0 %vm2649_vm9, %v2648_v34  ;;  %1951 = vmatpush3.bf16.msra.mxu0 %v2182_v61 }
 0x3ad   : > { %1952 = vmatprep.subr.bf16.mxu0 %v2648_v34  ;;  %v1892_v34 = vld [vmem:[%s949_s17] ss:$0 sm:$0xff] }
 0x3b0   : > { %1953 = vmatpush3.bf16.msra.mxu0 %v2183_v62  ;;  %v2195_v62 = vld [vmem:[%s3510_s8] sm:$0xff] (!%p1893_p13)  }
 0x47e   : > { %v1104_v38 = vpop.f32.mrb[0].mxu0 }
 0x47f   : > { %v1110_v39 = vadd.f32 %v1104_v38, %v1059_v33  ;;  %v1940_v40 = vpop.f32.mrb[1].mxu0 }
 0x480   : > { %v1107_v41 = vpop.f32.mrb[2].mxu0 }
 0x481   : > { %v1941_v42 = vpop.f32.mrb[3].mxu0  ;;  %v1112_v43 = vsel %vm1111_vm11, %v1110_v39, 0.0 }
 0x482   : > { %1113 = vadd.xlane.f32.xlu0 %v1112_v43  ;;  %v2192_v43 = vld [vmem:[#allocation15] sm:$0xff] (!%p1893_p13)  }
 0x50f   : > { %v1114_v44 = vpop.xlane.xlu0 %1113 }
 0x510   : > { %v1116_v45 = vmul.f32 0.03125, %v1114_v44  ;;  %v2193_v44 = vld [vmem:[#allocation17] sm:$0xff] (!%p1893_p13)  }
 0x512   : > { %v1117_v46 = vsub.f32 %v1110_v39, %v1116_v45  ;;  %v2650_v45 = vmov (!%p1893_p13), 0.0  }
 0x513   : > { %1964 = vmatprep.subr.bf16.mxu1 (!%p1893_p13), %v2650_v45  ;;  %1958 = vmatprep.subr.bf16.mxu0 (!%p1893_p13), %v2650_v45 }
 0x514   : > { %v1118_v47 = vmul.f32 %v1117_v46, %v1117_v46 }
 0x516   : > { %v1119_v48 = vsel %vm1111_vm11, %v1118_v47, 0.0  ;;  %v2194_v47 = vld [vmem:[#allocation15 + $0x8] sm:$0xff] (!%p1893_p13)  }
 0x517   : > { %1120 = vadd.xlane.f32.xlu0 %v1119_v48 }
 0x5a4   : > { %v1121_v51 = vpop.xlane.xlu0 %1120 }
 0x5a5   : > { %v1122_v52 = vmul.f32 0.03125, %v1121_v51 }
 0x5a7   : > { %v1123_v53 = vadd.f32 1e-05, %v1122_v52  ;;  %v1894_v52 = vld [vmem:[%s3509_s3] ss:$0 sm:$0xff] (!%p1893_p13) }
 0x5a9   : > { %2184 = vrsqrt.f32 %v1123_v53 }
 0x5b3   : > { %v2185_v54 = vpop.eup %2184 }
 0x5b4   : > { %v1125_v56 = vmul.f32 %v2185_v54, %v1117_v46  ;;  %v1355_v46 = vld [vmem:[#allocation3] sm:$0x3] (!%p1893_p13)  ;;  %v1895_v54 = vld [vmem:[#allocation14] ss:$0 sm:$0xff] (!%p1893_p13) }
 0x5b6   : > { %v1133_v58 = vmul.f32 %v1881_v55, %v1125_v56 }
 0x5b8   : > { %v1141_v59 = vadd.f32 %v1882_v57, %v1133_v58 }
 0x5ba   : > { %v1142_v60 = vpack.c.bf16 %v1141_v59, %v1141_v59 }
 0x5bc   : > { %1947 = vmatmul.mubr.msk.bf16.vlgmr.msra.gmra.mrb[0].mxu1 %vm1166_vm12, %v1142_v60 }
 0x5bd   : > { %1965 = vmatpush3.bf16.msra.mxu1 (!%p1893_p13), %v2192_v43  ;;  %1968 = vmatprep.mubr.msk.bf16.mxu1 (!%p1893_p13), %vm2651_vm14, %v2650_v45 }
 0x5be   : > { %1966 = vmatprep.subr.bf16.mxu1 (!%p1893_p13), %v2650_v45 }
 0x5c1   : > { %1967 = vmatpush3.bf16.msra.mxu1 (!%p1893_p13), %v2194_v47 }
 0x68f   : > { %v1204_v0 = vpop.f32.mrb[0].mxu1 }
 0x690   : > { %v1205_v1 = vadd.f32 %v1883_v63, %v1204_v0  ;;  %v1948_v2 = vpop.f32.mrb[1].mxu1  ;;  %v2196_v63 = vld [vmem:[%s3510_s8 + $0x8] sm:$0xff] (!%p1893_p13)   ;;  %v1554_v0 = vld [vmem:[%s3511_s10] sm:$0xf] (!%p1893_p13) }
 0x691   : > { %v1207_v3 = vpop.f32.mrb[2].mxu1  ;;  %v1555_v2 = vadd.f32 (!%p1893_p13), 1e-10, %v1554_v0 }
 0x692   : > { %v1210_v4 = vmul.f32 %v1205_v1, %v1205_v1  ;;  %v1949_v5 = vpop.f32.mrb[3].mxu1  ;;  %v1563_v3 = vld [vmem:[#allocation5] sm:$0xf] (!%p1893_p13) }
 0x693   : > { %v1570_v5 = vld [vmem:[#allocation4] sm:$0xf] (!%p1893_p13) }
 0x694   : > { %v1211_v6 = vmul.f32 %v1210_v4, %v1205_v1  ;;  %v1547_v4 = vld [vmem:[%s3512_s1] sm:$0xf] (!%p1893_p13) }
 0x696   : > { %v1212_v7 = vmul.f32 0.044715, %v1211_v6 }
 0x698   : > { %v1213_v8 = vadd.f32 %v1212_v7, %v1205_v1  ;;  %v1901_v7 = vld [vmem:[#allocation18] ss:$0 sm:$0xff] (!%p1893_p13) }
 0x69a   : > { %v1214_v9 = vmul.f32 0.7978846, %v1213_v8 }
 0x69c   : > { %2186 = vtanh.f32 %v1214_v9 }
 0x6a6   : > { %v2187_v10 = vpop.eup %2186 }
 0x6a7   : > { %v1216_v11 = vadd.f32 1.0, %v2187_v10 }
 0x6a9   : > { %v1217_v12 = vmul.f32 0.5, %v1216_v11 }
 0x6ab   : > { %v1218_v13 = vmul.f32 %v1217_v12, %v1205_v1  ;;  %v2652_v1 = vmov (!%p1893_p13), 0  }
 0x6ac   : > { %2190 = vset.pattern.permute.xlu1 (!%p1893_p13), %v2652_v1  ;;  %2191 = vset.pattern.permute.xlu0 (!%p1893_p13), %v2652_v1 }
 0x6ad   : > { %v1219_v14 = vpack.c.bf16 %v1218_v13, %v1218_v13 }
 0x6af   : > { %1955 = vmatmul.mubr.msk.bf16.vlgmr.msra.gmra.mrb[4].mxu0 %vm1166_vm12, %v1219_v14 }
 0x6b0   : > { %1959 = vmatpush3.bf16.msra.mxu0 (!%p1893_p13), %v2193_v44  ;;  %1960 = vmatprep.mubr.msk.bf16.mxu0 (!%p1893_p13), %vm2651_vm14, %v2650_v45 }
 0x6b1   : > { %1972 = vmatprep.subr.bf16.mxu0 (!%p1893_p13), %v2650_v45 }
 0x6b7   : > { %1961 = vmatmul.mubr.msk.bf16.vlgmr.msra.gmra.mrb[0].mxu0 (!%p1893_p13), %vm1364_vm13, %v1355_v46 }
 0x6b8   : > { %1976 = vmatprep.mubr.msk.bf16.mxu0 (!%p1893_p13), %vm2651_vm14, %v2650_v45  ;;  %1973 = vmatpush3.bf16.msra.mxu0 (!%p1893_p13), %v2195_v62 }
 0x6b9   : > { %1974 = vmatprep.subr.bf16.mxu0 (!%p1893_p13), %v2650_v45 }
 0x6bc   : > { %1975 = vmatpush3.bf16.msra.mxu0 (!%p1893_p13), %v2196_v63 }
 0x782   : > { %v1280_v16 = vpop.f32.mrb[4].mxu0 }
 0x783   : > { %v1281_v17 = vadd.f32 %v1887_v15, %v1280_v16  ;;  %v1956_v18 = vpop.f32.mrb[5].mxu0 }
 0x784   : > { %v1283_v19 = vpop.f32.mrb[6].mxu0 }
 0x785   : > { %v1957_v20 = vpop.f32.mrb[7].mxu0  ;;  %v1286_v21 = vadd.f32 %v1281_v17, %v1141_v59 }
 0x787   : > { %v1287_v22 = vsel %vm1111_vm11, %v1286_v21, 0.0 }
 0x788   : > { %1288 = vadd.xlane.f32.xlu1 %v1287_v22 }
 0x78a   : > { %v1402_v58 = vpop.f32.mrb[0].mxu0 (!%p1893_p13) }
 0x78b   : > { %v1962_v59 = vpop.f32.mrb[1].mxu0 (!%p1893_p13) }
 0x78c   : > { %v1405_v60 = vpop.f32.mrb[2].mxu0 (!%p1893_p13) }
 0x78d   : > { %v1963_v61 = vpop.f32.mrb[3].mxu0 (!%p1893_p13) }
 0x815   : > { %v1289_v23 = vpop.xlane.xlu1 %1288 }
 0x816   : > { %v1290_v24 = vmul.f32 0.03125, %v1289_v23 }
 0x818   : > { %v1291_v25 = vsub.f32 %v1286_v21, %v1290_v24  ;;  %v1902_v24 = vld [vmem:[#allocation20] ss:$0 sm:$0xff] (!%p1893_p13) }
 0x81a   : > { %v1292_v26 = vmul.f32 %v1291_v25, %v1291_v25 }
 0x81c   : > { %v1293_v27 = vsel %vm1111_vm11, %v1292_v26, 0.0 }
 0x81d   : > { %1294 = vadd.xlane.f32.xlu1 %v1293_v27 }
 0x82e   : > { %1558 = vperm.xlu1 (!%p1893_p13), %2190, %v1555_v2  }
 0x832   : > { %1550 = vperm.xlu1 (!%p1893_p13), %2190, %v1547_v4  }
 0x836   : > { %1573 = vperm.xlu1 (!%p1893_p13), %2190, %v1570_v5  }
 0x8aa   : > { %v1295_v28 = vpop.xlane.xlu1 %1294 }
 0x8ab   : > { %v1296_v29 = vmul.f32 0.03125, %v1295_v28 }
 0x8ad   : > { %v1297_v30 = vadd.f32 1e-05, %v1296_v29 }
 0x8ae   : > { %v1559_v23 = vpop.permute.xlu1 (!%p1893_p13), %1558 }
 0x8af   : > { %2188 = vrsqrt.f32 %v1297_v30 }
 0x8b2   : > { %v1551_v29 = vpop.permute.xlu1 (!%p1893_p13), %1550 }
 0x8b9   : > { %v2189_v31 = vpop.eup %2188 }
 0x8ba   : > { %v1299_v33 = vmul.f32 %v2189_v31, %v1291_v25  ;;  %1320 = sbr.rel (%p1893_p13) target bundleno = 3023 (0xbcf), region = 152 }
 0x8bc   : > { %v1307_v35 = vmul.f32 %v1891_v32, %v1299_v33 }
 0x8be   : > { %v1315_v36 = vadd.f32 %v1892_v34, %v1307_v35 }
 0x8c0   : > { %1316 = vst.msk [vmem:[#allocation2] sm:$0xf] %vm1111_vm11, %v1315_v36  ;;  %v1321_v37 = vsel (!%p1893_p13), %vm1111_vm11, %v1315_v36, 0.0 }
 0x8c1   : > { %1322 = vadd.xlane.f32.xlu0 %v1321_v37 }
 0x94e   : > { %v1323_v38 = vpop.xlane.xlu0 %1322 }
 0x94f   : > { %v1324_v39 = vmul.f32 0.03125, %v1323_v38 }
 0x951   : > { %v1325_v40 = vsub.f32 %v1315_v36, %v1324_v39  ;;  %v1574_v36 = vpop.permute.xlu1 %1573 }
 0x953   : > { %v1326_v41 = vmul.f32 %v1325_v40, %v1325_v40 }
 0x955   : > { %v1327_v42 = vsel %vm1111_vm11, %v1326_v41, 0.0 }
 0x956   : > { %1328 = vadd.xlane.f32.xlu0 %v1327_v42 }
 0x96c   : > { %1566 = vperm.xlu0 %2191, %v1563_v3  }
 0x9e3   : > { %v1329_v48 = vpop.xlane.xlu0 %1328 }
 0x9e4   : > { %v1330_v49 = vmul.f32 0.03125, %v1329_v48 }
 0x9e6   : > { %v1331_v50 = vadd.f32 1e-05, %v1330_v49 }
 0x9e8   : > { %2197 = vrsqrt.f32 %v1331_v50 }
 0x9eb   : > { %v1567_v33 = vpop.permute.xlu0 %1566 }
 0x9f2   : > { %v2198_v51 = vpop.eup %2197 }
 0x9f3   : > { %v1333_v53 = vmul.f32 %v2198_v51, %v1325_v40 }
 0x9f5   : > { %v1341_v55 = vmul.f32 %v1894_v52, %v1333_v53 }
 0x9f7   : > { %v1349_v56 = vadd.f32 %v1895_v54, %v1341_v55 }
 0x9f9   : > { %v1350_v57 = vpack.c.bf16 %v1349_v56, %v1349_v56 }
 0x9fb   : > { %1969 = vmatmul.mubr.msk.bf16.vlgmr.msra.gmra.mrb[0].mxu1 %vm1166_vm12, %v1350_v57 }
 0xace   : > { %v1457_v6 = vpop.f32.mrb[0].mxu1 }
 0xacf   : > { %v1458_v8 = vadd.f32 %v1457_v6, %v1402_v58  ;;  %v1970_v9 = vpop.f32.mrb[1].mxu1 }
 0xad0   : > { %v1460_v10 = vpop.f32.mrb[2].mxu1 }
 0xad1   : > { %v1470_v11 = vadd.f32 %v1901_v7, %v1458_v8  ;;  %v1971_v12 = vpop.f32.mrb[3].mxu1 }
 0xad3   : > { %v1471_v13 = vmul.f32 %v1470_v11, %v1470_v11 }
 0xad5   : > { %v1472_v14 = vmul.f32 %v1471_v13, %v1470_v11 }
 0xad7   : > { %v1473_v15 = vmul.f32 0.044715, %v1472_v14 }
 0xad9   : > { %v1474_v16 = vadd.f32 %v1473_v15, %v1470_v11 }
 0xadb   : > { %v1475_v17 = vmul.f32 0.7978846, %v1474_v16 }
 0xadd   : > { %2199 = vtanh.f32 %v1475_v17 }
 0xade   : > { %2201 = vrcp.f32 %v1559_v23 }
 0xae7   : > { %v2200_v18 = vpop.eup %2199 }
 0xae8   : > { %v1477_v19 = vadd.f32 1.0, %v2200_v18  ;;  %v2202_v28 = vpop.eup %2201 }
 0xaea   : > { %v1478_v20 = vmul.f32 0.5, %v1477_v19 }
 0xaec   : > { %v1479_v21 = vmul.f32 %v1478_v20, %v1470_v11 }
 0xaee   : > { %v1480_v22 = vpack.c.bf16 %v1479_v21, %v1479_v21 }
 0xaf0   : > { %1977 = vmatmul.mubr.msk.bf16.vlgmr.msra.gmra.mrb[4].mxu0 %vm1166_vm12, %v1480_v22 }
 0xbc3   : > { %v1541_v25 = vpop.f32.mrb[4].mxu0 }
 0xbc4   : > { %v1542_v26 = vadd.f32 %v1902_v24, %v1541_v25  ;;  %v1978_v27 = vpop.f32.mrb[5].mxu0 }
 0xbc5   : > { %v1544_v30 = vpop.f32.mrb[6].mxu0 }
 0xbc6   : > { %v1553_v31 = vsub.f32 %v1542_v26, %v1551_v29  ;;  %v1979_v32 = vpop.f32.mrb[7].mxu0 }
 0xbc8   : > { %v1562_v34 = vmul.f32 %v2202_v28, %v1553_v31 }
 0xbca   : > { %v1569_v35 = vmul.f32 %v1567_v33, %v1562_v34 }
 0xbcc   : > { %v1576_v37 = vadd.f32 %v1574_v36, %v1569_v35 }
 0xbce   : > { %1578 = vst.msk [vmem:[%s923_s18] sm:$0xf] %vm1577_vm15, %v1576_v37 }
 0xbcf PF: > { %s3513_s13 = sld [smem:[#allocation35_spill]]  ;;  %s3514_s14 = sld [smem:[#allocation30_spill]] }
 0xbd0   : > { %s3515_s23 = sld [smem:[#allocation43_spill]]  ;;  %s3516_s19 = sld [smem:[#allocation65_spill]] }
 0xbd1   : > { %s1593_s28 = sshll.u32 %s923_s18, 4  ;;  %s2653_s29 = smov [#allocation21]   ;;  %s1594_s28 = int_to_ptr.vmem [resolvable:$true] %s1593_s28 }
 0xbd2   : > { %s2489_s5 = scalar_lea.vmem %s1594_s28, 64  ;;  %s2493_s16 = sshll.u32 %s2653_s29, 4  ;;  %s2494_s16 = int_to_ptr.vmem [resolvable:$false] %s2493_s16 }
 0xbd3   : > { %p2490_p12 = scmp.ne.s32.totalorder %s1594_s28, %s2489_s5  ;;  %s2495_s17 = scalar_lea.vmem %s2494_s16, 128 }
 0xbd4   : > { %p2496_p1 = scmp.lt.s32.totalorder %s1594_s28, %s2494_s16  ;;  %p2497_p0 = scmp.lt.s32.totalorder %s2495_s17, %s2489_s5 }
 0xbd5   : > { %s1907_s7 = sshll.u32 %s3513_s13, 6  ;;  %s3517_s21 = sand.u32 1, %s3514_s14  }
 0xbd6   : > { %s3279_s30 = scalar_lea.hbm %s3516_s19, %s1907_s7  ;;  %s1580_s22 = scalar_lea.sflag [#allocation8], %s3517_s21 }
 0xbd7   : > { %p3518_p8 = scmp.ne.s32.totalorder %s3515_s23, 0  ;;  %p2498_p3 = por %p2497_p0, %p2496_p1 }
 0xbd9   : > { %p2491_p7 = pnand %p2490_p12, %p3518_p8 }
 0xbdb   : > { %p2492_p4 = pneg %p2491_p7 }
 0xbdd   : > { %p2499_p2 = pnand %p2498_p3, %p2492_p4 }
 0xbdf   : > { %2502 = shalt.err (!%p2499_p2)
}
 0xbe0   : > { %s2503_s18 = scalar_lea.hbm %s3279_s30, 64  ;;  %s2507_s27 = scalar_lea.hbm %s3516_s19, 128 }
 0xbe1   : > { %p2504_p5 = scmp.ne.s32.totalorder %s3279_s30, %s2503_s18  ;;  %p2508_p11 = scmp.lt.u32.totalorder %s3279_s30, %s3516_s19 }
 0xbe2   : > { %p2509_p6 = scmp.lt.u32.totalorder %s2507_s27, %s2503_s18  ;;  %p2511_p12 = scmp.lt.u32.totalorder %s2503_s18, %s3279_s30 }
 0xbe3   : > { %p2505_p10 = pnand %p2504_p5, %p3518_p8 }
 0xbe4   : > { %p2510_p13 = por %p2509_p6, %p2508_p11 }
 0xbe5   : > { %p2506_p9 = pneg %p2505_p10 }
 0xbe6   : > { %p2512_p7 = por %p2511_p12, %p2510_p13 }
 0xbe8   : > { %p2513_p4 = pnand %p2512_p7, %p2506_p9 }
 0xbea   : > { %2516 = shalt.err (!%p2513_p4)
}
 0xbeb   : > { %2014 = dma.vmem_to_hbm [thread:$0]  (%p3518_p8), %s1594_s28, 64, %s3279_s30, %s1580_s22  }
 0xbec PF: > { %s3519_s9 = sld [smem:[#allocation37_spill]]  ;;  %s3520_s15 = sld [smem:[#allocation29_spill]] }
 0xbed   : > { %s3521_s0 = sld [smem:[#allocation44_spill]] }
 0xbf2   : > { %p2067_p1 = scmp.ge.s32.totalorder %s3519_s9, 2  ;;  %s1605_s10 = sand.u32 1, %s3520_s15  }
 0xbf3   : > { %p3522_p0 = scmp.ne.s32.totalorder %s3521_s0, 0  ;;  %s1606_s2 = scalar_lea.sflag [#allocation8], %s1605_s10 }
 0xbf5   : > { %p2049_p3 = pnand %p2067_p1, %p3522_p0 }
 0xbf7   : > { %2586 = dma.done.wait (!%p2049_p3), %s1606_s2, 64  }
 0xbf8   : > { %2588 = vsyncadd (!%p2049_p3), %s1606_s2, 4294967232  ;;  %s38_s5 = sadd.s32 1, %s3519_s9   ;;  %s3523_s2 = sld [smem:[#allocation30_spill]] }
 0xbf9   : > { %p35_p2 = scmp.ge.s32.totalorder %s38_s5, 6   ;;  %s3524_s25 = sld [smem:[#allocation31_spill]] }
 0xbfa   : > { %s3525_s26 = sld [smem:[#allocation42_spill]]  ;;  %s3526_s27 = sld [smem:[#allocation32_spill]] }
 0xbfb   : > { %s3527_s3 = sld [smem:[#allocation33_spill]]  ;;  %s3528_s28 = sld [smem:[#allocation40_spill]] }
 0xbfc   : > { %s3529_s0 = sld [smem:[#allocation36_spill]]  ;;  %s3530_s1 = sld [smem:[#allocation38_spill]] }
 0xbfd   : > { %s3531_s30 = sld [smem:[#allocation39_spill]]  ;;  %s3532_s29 = smov %s2623_s4 }
 0xbfe   :  { %37 = sbr.rel (!%p35_p2) target bundleno = 33 (0x21), region = 227 }
 0xc02   : > { %s3533_s4 = smov %s3530_s1 }
 0xc05   :  { %1611 = vsyncpa [#allocation7], 1 }
 0xc06   :  { %1613 = vsyncpa [#allocation7 + $0x1], 1 }
 0xc07   :  { %1614 = vsyncpa [#allocation10], 1 }
 0xc08   :  { %1615 = vsyncpa [#allocation16], 1 }
 0xc09   :  { %1616 = vsyncpa [#allocation19], 1 }
 0xc0a   :  { %1617 = vsyncpa [#allocation8], 1 }
 0xc0b   :  { %1619 = vsyncpa [#allocation8 + $0x1], 1 }

</bundles_post_ra>
